<compile_context>
chip_gen: v6e
topology: v6e:2x2x1
jax: 0.10.0
libtpu: 0.0.40
codegen_flags: <defaults>
</compile_context>

<pallas_src>
import functools

import jax
import jax.numpy as jnp
from jax import lax
from jax.experimental import pallas as pl
from jax.experimental.pallas import tpu as pltpu
from jax.scipy.special import gammaln

EPS = 1e-10
_HALF_LOG_2PI = 0.9189385332046727
LANE = 128
_LG_SHIFTS = 5      # shift until z >= _LG_ZMIN (was 8); Stirling truncation ~8e-9 at z=5
_LG_ZMIN = 5.0


# ----------------------------------------------------------------------------
# In-kernel math helpers (traced inside the Pallas kernels)
# ----------------------------------------------------------------------------
def _lgamma_parts(x):
    """Return (stirling(z), prod) with lgamma(x) = stirling(z) - log(prod), x > 0.

    The log of the shift product is left to the caller so the three lgammas of one NB
    term can share/fold their shift logs.
    """
    prod = jnp.ones_like(x)
    z = x
    for _ in range(_LG_SHIFTS):
        small = z < _LG_ZMIN
        prod = prod * jnp.where(small, z, 1.0)    # VPU mul/select, no EUP per iteration
        z = jnp.where(small, z + 1.0, z)
    zinv = pl.reciprocal(z, approx=True)          # z >= 5; only feeds the tiny series
    zinv2 = zinv * zinv
    series = zinv * (1.0 / 12.0 + zinv2 * (-1.0 / 360.0 + zinv2 * (1.0 / 1260.0)))
    return (z - 0.5) * jnp.log(z) - z + _HALF_LOG_2PI + series, prod


def _nb_terms(preds, theta_raw, truth):
    """Per-element NB loss with shared/folded logarithms.

    Returns (nb_loss, theta_clamped, log(theta+eps), log(theta+preds+eps)) so the ZINB
    path can reuse the logs.
    """
    theta = jnp.minimum(theta_raw, 1e6)           # torch.clamp(theta, max=1e6)
    log_theta = jnp.log(theta + EPS)
    log_tp = jnp.log(theta + preds + EPS)
    log_pred = jnp.log(preds + EPS)
    st_a, pa = _lgamma_parts(theta + EPS)
    st_b, pb = _lgamma_parts(truth + 1.0)
    st_c, pc = _lgamma_parts(truth + theta + EPS)
    # lgamma(a) + lgamma(b) - lgamma(c): shift logs folded -> log(pa*pb) - log(pc)
    lg = (st_a + st_b - st_c) - jnp.log(pa * pb) + jnp.log(pc)
    # log1p(y_pred/(theta+eps)) == log(theta+y_pred+eps) - log(theta+eps)
    # TODO(synk): the folded form loses precision when y_pred << theta with theta near the
    # 1e6 clamp; fine for typical count-data regimes and within the test tolerance.
    t2 = (theta + truth) * (log_tp - log_theta) + truth * (log_theta - log_pred)
    return lg + t2, theta, log_theta, log_tp


# ----------------------------------------------------------------------------
# Fused NB + ZINB mean-loss kernel
# ----------------------------------------------------------------------------
def _fused_nb_zinb_kernel(p1_ref, th1_ref, y1_ref, p2_ref, th2_ref, pi_ref, y2_ref,
                          *refs, combine, inv_count1, inv_count2, sub_r, n_sub):
    if combine:
        o1_ref, acc1_ref = refs
        o2_ref = acc2_ref = None
    else:
        o1_ref, o2_ref, acc1_ref, acc2_ref = refs

    j = pl.program_id(1)

    @pl.when(j == 0)
    def _():
        acc1_ref[...] = jnp.zeros_like(acc1_ref)
        if not combine:
            acc2_ref[...] = jnp.zeros_like(acc2_ref)

    def fold8(v):
        # (sub_r, LANE) -> (8, LANE) via static-slice VPU adds (no XLU).
        if sub_r == 8:
            return v
        out = v[0:8, :]
        for k in range(1, sub_r // 8):
            out = out + v[k * 8:(k + 1) * 8, :]
        return out

    def sub_losses(c):
        # Small (sub_r, 128) compute chunk keeps every intermediate vreg-resident.
        r = pl.multiple_of(c * sub_r, sub_r)
        rows = pl.ds(r, sub_r)
        nb1, _, _, _ = _nb_terms(p1_ref[rows, :], th1_ref[rows, :], y1_ref[rows, :])
        preds2 = p2_ref[rows, :]
        truth2 = y2_ref[rows, :]
        pi = pi_ref[rows, :]
        nb2, theta2, log_theta2, log_tp2 = _nb_terms(preds2, th2_ref[rows, :], truth2)
        # ZINB (ridge_lambda = tv_lambda = 0 -> those terms are exactly 0)
        nb_case = nb2 - jnp.log(1.0 - pi + EPS)
        zero_nb = jnp.exp(theta2 * (log_theta2 - log_tp2))   # pow(theta/(theta+pred+eps), theta)
        zero_case = -jnp.log(pi + (1.0 - pi) * zero_nb + EPS)
        zinb = jnp.where(truth2 < 1e-8, zero_case, nb_case)
        return nb1, zinb

    zero8 = jnp.zeros((8, LANE), jnp.float32)

    if combine:
        def body(c, acc):
            nb1, zinb = sub_losses(c)
            return acc + fold8(nb1 + zinb)
        acc = lax.fori_loop(0, n_sub, body, zero8)
        acc1_ref[...] += acc
    else:
        def body(c, carry):
            a1, a2 = carry
            nb1, zinb = sub_losses(c)
            return a1 + fold8(nb1), a2 + fold8(zinb)
        a1, a2 = lax.fori_loop(0, n_sub, body, (zero8, zero8))
        acc1_ref[...] += a1
        acc2_ref[...] += a2

    @pl.when(j == pl.num_programs(1) - 1)
    def _():
        o1_ref[...] = acc1_ref[...] * inv_count1
        if not combine:
            o2_ref[...] = acc2_ref[...] * inv_count2


def _num_tensorcores():
    """2 on v7x (2 TensorCores/chip); 1 on v5e/v6e; safe fallback 1."""
    try:
        kind = (getattr(jax.devices()[0], "device_kind", "") or "").lower()
        if "v7" in kind:
            return 2
    except Exception:
        pass
    return 1


def _plan(n_elems_max, n_tc, lane=LANE, max_tile_rows=1024):
    """Pick (rows_padded, tile_r, sub_r, n_par, inner) for the packed (rows, lane) layout."""
    rows = -(-n_elems_max // lane)
    rows8 = ((rows + 7) // 8) * 8
    # Shard across TensorCores only on 2-TC parts and only when each core gets real work.
    n_par = 2 if (n_tc >= 2 and rows8 >= 2 * 64) else 1
    n_tiles = -(-rows8 // max_tile_rows)
    n_tiles = -(-n_tiles // n_par) * n_par               # multiple of n_par
    tile_r = ((-(-rows8 // n_tiles) + 7) // 8) * 8       # DMA rows per tile, multiple of 8
    sub_r = 16 if tile_r % 16 == 0 else 8                # in-kernel compute chunk
    rows_pad = n_tiles * tile_r
    inner = n_tiles // n_par
    return rows_pad, tile_r, sub_r, n_par, inner


def _pack(x, rows_pad, lane, fill):
    """Free reshape to (rows, lane) when sizes line up; otherwise pad with neutral values."""
    flat = jnp.ravel(x)
    if flat.dtype != jnp.float32:
        flat = flat.astype(jnp.float32)
    pad = rows_pad * lane - flat.shape[0]
    if pad:
        # TODO(synk): ragged tails could instead be masked in-kernel via an SMEM row count;
        # padded elements contribute ~0 and we divide by the true element count anyway.
        flat = jnp.concatenate([flat, jnp.full((pad,), fill, jnp.float32)])
    return flat.reshape(rows_pad, lane)


def fused_nb_zinb_loss(nb_preds, nb_theta, nb_truth,
                       zi_preds, zi_theta, zi_pi, zi_truth,
                       *, lane=LANE, max_tile_rows=1024):
    """Returns loss1 + loss2 = NegativeBinomialLoss(mean) + ZINB loss(mean), one pallas_call."""
    n1 = int(nb_preds.size)
    n2 = int(zi_preds.size)
    combine = (n1 == n2)       # common case: matched gene dims -> single accumulator/output
    n_tc = _num_tensorcores()
    rows_pad, tile_r, sub_r, n_par, inner = _plan(max(n1, n2), n_tc, lane, max_tile_rows)
    n_sub = tile_r // sub_r

    # Neutral padding (pred=0, theta=1, truth=0, pi=0) contributes ~0 to either loss; we
    # divide by the true element counts, so padded rows do not change the means.
    p1 = _pack(nb_preds, rows_pad, lane, 0.0)
    t1 = _pack(nb_theta, rows_pad, lane, 1.0)
    y1 = _pack(nb_truth, rows_pad, lane, 0.0)
    p2 = _pack(zi_preds, rows_pad, lane, 0.0)
    t2 = _pack(zi_theta, rows_pad, lane, 1.0)
    pi = _pack(zi_pi, rows_pad, lane, 0.0)
    y2 = _pack(zi_truth, rows_pad, lane, 0.0)

    kernel = functools.partial(_fused_nb_zinb_kernel, combine=combine,
                               inv_count1=1.0 / n1, inv_count2=1.0 / n2,
                               sub_r=sub_r, n_sub=n_sub)
    in_spec = pl.BlockSpec((tile_r, lane), lambda i, j: (i * inner + j, 0))
    out_spec = pl.BlockSpec((8, lane), lambda i, j: (i, 0))
    out_sds = jax.ShapeDtypeStruct((n_par * 8, lane), jnp.float32)

    if combine:
        out_shapes = (out_sds,)
        out_specs = [out_spec]
        scratch = [pltpu.VMEM((8, lane), jnp.float32)]
    else:
        out_shapes = (out_sds, out_sds)
        out_specs = [out_spec, out_spec]
        scratch = [pltpu.VMEM((8, lane), jnp.float32),
                   pltpu.VMEM((8, lane), jnp.float32)]

    tile_bytes = tile_r * lane * 4
    vmem_budget = 7 * 2 * tile_bytes + (4 << 20)         # dbl-buffered inputs + headroom
    vmem_limit = int(min(32 * 1024 * 1024, max(vmem_budget, 8 * 1024 * 1024)))

    outs = pl.pallas_call(
        kernel,
        out_shape=out_shapes,
        grid_spec=pltpu.PrefetchScalarGridSpec(
            num_scalar_prefetch=0,
            grid=(n_par, inner),
            in_specs=[in_spec] * 7,
            out_specs=out_specs,
            scratch_shapes=scratch,
        ),
        compiler_params=pltpu.CompilerParams(
            dimension_semantics=("parallel", "arbitrary"),
            vmem_limit_bytes=vmem_limit,
        ),
    )(p1, t1, y1, p2, t2, pi, y2)

    if combine:
        return jnp.sum(outs[0])
    return jnp.sum(outs[0]) + jnp.sum(outs[1])


# ----------------------------------------------------------------------------
# Fused tiny losses: both DistanceProbLoss terms + the link term, one launch,
# packed into a single lane-dense (1, 128) output.
# ----------------------------------------------------------------------------
def _small_losses_kernel(z1_ref, lp1_ref, z2_ref, lp2_ref, e1_ref, e2_ref, out_ref,
                         *, weight, inv_batch, inv_link_count):
    z1 = z1_ref[...]
    z2 = z2_ref[...]
    # F.pairwise_distance(a, b, p=1, eps=1e-6) == sum(|a - b + 1e-6|, axis=-1)
    d1 = jnp.sum(jnp.abs(z1 - z2 + 1e-6), axis=-1, keepdims=True)   # (B,1)
    d2 = jnp.sum(jnp.abs(z2 - z1 + 1e-6), axis=-1, keepdims=True)   # (B,1)
    inv1 = jnp.sum(weight * d1 - lp1_ref[...], axis=0, keepdims=True) * inv_batch   # (1,1)
    inv2 = jnp.sum(weight * d2 - lp2_ref[...], axis=0, keepdims=True) * inv_batch   # (1,1)
    diff = jnp.abs(e1_ref[...] - e2_ref[...])
    link = jnp.sum(jnp.sum(diff, axis=1, keepdims=True),
                   axis=0, keepdims=True) * inv_link_count                          # (1,1)
    lane_idx = lax.broadcasted_iota(jnp.int32, (1, LANE), 1)
    out_ref[...] = jnp.where(lane_idx == 0, inv1,
                             jnp.where(lane_idx == 1, inv2,
                                       jnp.where(lane_idx == 2, link, 0.0)))


def small_losses_pallas(z1, logp1, z2, logp2, enc1, enc2, weight=5.0):
    """Returns (DistanceProbLoss(z1->z2), DistanceProbLoss(z2->z1), mean|enc1-enc2|)."""
    B = z1.shape[0]
    kernel = functools.partial(_small_losses_kernel, weight=weight,
                               inv_batch=1.0 / B, inv_link_count=1.0 / int(enc1.size))
    vmem = pl.BlockSpec(memory_space=pltpu.MemorySpace.VMEM)
    out = pl.pallas_call(
        kernel,
        out_shape=jax.ShapeDtypeStruct((1, LANE), jnp.float32),
        in_specs=[vmem] * 6,
        out_specs=vmem,
    )(z1.astype(jnp.float32), logp1.reshape(B, 1).astype(jnp.float32),
      z2.astype(jnp.float32), logp2.reshape(B, 1).astype(jnp.float32),
      enc1.astype(jnp.float32), enc2.astype(jnp.float32))
    return out[0, 0], out[0, 1], out[0, 2]


# ----------------------------------------------------------------------------
# Module-level glue (plain Python / JAX)
# ----------------------------------------------------------------------------
def delayed_linear_warmup(delay, inc, t_max):
    # TODO(synk): layers.DelayedLinearWarmup source is unavailable; assumed to yield 0.0
    # for `delay` steps, then ramp by `inc` per step up to `t_max`.
    step = 0
    val = 0.0
    while True:
        step += 1
        if step > delay:
            val = min(val + inc, t_max)
        yield val


class PairedLossInvertiblePallas:
    """JAX/Pallas port of PairedLossInvertible (default loss1/loss2/loss3)."""

    def __init__(self, link_strength=0.001, inv_strength=1.0):
        self.link = link_strength
        self.link_warmup = delayed_linear_warmup(1000, 0.005, link_strength)
        self.inv_warmup = delayed_linear_warmup(2000, 0.005, inv_strength)

    def __call__(self, preds, target):
        preds1, preds2, (enc1_pred, enc2_pred) = preds
        target1, target2 = target

        # loss1 (NB): preds, theta = preds1[:2]; truth = target1[0]
        # loss2 (ZINB): preds, theta, pi = preds2[:3]; truth = target2
        # TODO(synk): torch debug-mode NaN/Inf/negativity asserts are host-side only; skipped.
        retval = fused_nb_zinb_loss(
            preds1[0], preds1[1], target1[0],
            preds2[0], preds2[1], preds2[2], target2)

        encoded1 = preds1[-1]
        encoded2 = preds2[-1]
        # One launch for both DistanceProbLoss terms and the link term.
        # TODO(synk): DistanceProbLoss raises ValueError on NaN; that data-dependent raise
        # is checked host-side in the demo instead of inside the traced computation.
        inv_loss1, inv_loss2, link_d = small_losses_pallas(
            enc1_pred[0], enc1_pred[1], enc2_pred[0], enc2_pred[1], encoded1, encoded2)

        if self.link > 0:
            l = next(self.link_warmup)
            if l > 1e-6:  # warmup starts at 0 -> skipped on early steps, as in PyTorch
                retval = retval + l * link_d
        retval = retval + next(self.inv_warmup) * (inv_loss1 + inv_loss2)
        return retval


# ----------------------------------------------------------------------------
# Pure-JAX reference (numerical sanity check only)
# ----------------------------------------------------------------------------
def _nb_ref(preds, theta, truth, mean=True):
    th = jnp.minimum(theta, 1e6)
    t1 = gammaln(th + EPS) + gammaln(truth + 1.0) - gammaln(truth + th + EPS)
    t2 = (th + truth) * jnp.log1p(preds / (th + EPS)) + truth * (
        jnp.log(th + EPS) - jnp.log(preds + EPS)
    )
    r = t1 + t2
    return jnp.mean(r) if mean else r


def _zinb_ref(preds, theta, pi, truth):
    nb_case = _nb_ref(preds, theta, truth, mean=False) - jnp.log(1.0 - pi + EPS)
    th = jnp.minimum(theta, 1e6)
    zero_nb = jnp.power(th / (th + preds + EPS), th)
    zero_case = -jnp.log(pi + (1.0 - pi) * zero_nb + EPS)
    return jnp.mean(jnp.where(truth < 1e-8, zero_case, nb_case))


if __name__ == "__main__":
    B, G1, G2, L = 4, 256, 256, 32
    key = jax.random.PRNGKey(0)
    ks = jax.random.split(key, 13)

    # Autoencoder 1 (NB): (mean, dispersion, encoded); target1 is a (truth,) batch tuple.
    mean1 = jnp.exp(0.3 * jax.random.normal(ks[0], (B, G1))).astype(jnp.float32)
    theta1 = (jnp.exp(0.3 * jax.random.normal(ks[1], (B, G1))) + 0.5).astype(jnp.float32)
    enc1 = jax.random.normal(ks[2], (B, L), dtype=jnp.float32)
    truth1 = jax.random.poisson(ks[3], 2.0, (B, G1)).astype(jnp.float32)

    # Autoencoder 2 (ZINB): (mean, dispersion, dropout, encoded); target2 is the truth array.
    mean2 = jnp.exp(0.3 * jax.random.normal(ks[4], (B, G2))).astype(jnp.float32)
    theta2 = (jnp.exp(0.3 * jax.random.normal(ks[5], (B, G2))) + 0.5).astype(jnp.float32)
    pi2 = jax.nn.sigmoid(jax.random.normal(ks[6], (B, G2))).astype(jnp.float32)
    enc2 = jax.random.normal(ks[7], (B, L), dtype=jnp.float32)
    truth2 = jax.random.poisson(ks[8], 1.0, (B, G2)).astype(jnp.float32)

    # Invertible-network predictions: (z, logp) tuples.
    z1 = jax.random.normal(ks[9], (B, L), dtype=jnp.float32)
    logp1 = jax.random.normal(ks[10], (B,), dtype=jnp.float32)
    z2 = jax.random.normal(ks[11], (B, L), dtype=jnp.float32)
    logp2 = jax.random.normal(ks[12], (B,), dtype=jnp.float32)

    preds = (
        (mean1, theta1, enc1),
        (mean2, theta2, pi2, enc2),
        ((z1, logp1), (z2, logp2)),
    )
    target = ((truth1,), truth2)

    loss_mod = PairedLossInvertiblePallas()
    out = loss_mod(preds, target)
    out = jax.block_until_ready(out)

    # Sanity check against a pure-JAX reference (warmup factors are 0 on step 1,
    # so the combined loss equals loss1 + loss2).
    ref = _nb_ref(mean1, theta1, truth1) + _zinb_ref(mean2, theta2, pi2, truth2)
    ref = jax.block_until_ready(ref)
    if not bool(jnp.isfinite(out)):
        raise ValueError("NaN")
    if abs(float(out) - float(ref)) > 1e-2 + 5e-3 * abs(float(ref)):
        raise AssertionError(f"mismatch: pallas={float(out)} ref={float(ref)}")

    print("KERNEL_OK")
</pallas_src>

<mosaic_0001>
module attributes {stable_mosaic.version = 11 : i64} {
  func.func @_fused_nb_zinb_kernel(%arg0: i32, %arg1: i32, %arg2: memref<8x128xf32, #tpu.memory_space<vmem>>, %arg3: memref<8x128xf32, #tpu.memory_space<vmem>>, %arg4: memref<8x128xf32, #tpu.memory_space<vmem>>, %arg5: memref<8x128xf32, #tpu.memory_space<vmem>>, %arg6: memref<8x128xf32, #tpu.memory_space<vmem>>, %arg7: memref<8x128xf32, #tpu.memory_space<vmem>>, %arg8: memref<8x128xf32, #tpu.memory_space<vmem>>, %arg9: memref<8x128xf32, #tpu.memory_space<vmem>>, %arg10: memref<8x128xf32, #tpu.memory_space<vmem>>) attributes {dimension_semantics = [#tpu.dimension_semantics<parallel>, #tpu.dimension_semantics<arbitrary>], iteration_bounds = array<i64: 1, 1>, scalar_prefetch = 0 : i64, scratch_operands = 1 : i64, tpu.core_type = #tpu.core_type<tc>, window_params = [{transform_indices = @transform_0, window_bounds = array<i64: 8, 128>}, {transform_indices = @transform_1, window_bounds = array<i64: 8, 128>}, {transform_indices = @transform_2, window_bounds = array<i64: 8, 128>}, {transform_indices = @transform_3, window_bounds = array<i64: 8, 128>}, {transform_indices = @transform_4, window_bounds = array<i64: 8, 128>}, {transform_indices = @transform_5, window_bounds = array<i64: 8, 128>}, {transform_indices = @transform_6, window_bounds = array<i64: 8, 128>}, {transform_indices = @transform_7, window_bounds = array<i64: 8, 128>}]} {
    %c0_i32 = arith.constant 0 : i32
    %0 = arith.cmpi eq, %arg1, %c0_i32 : i32
    %1 = arith.extui %0 : i1 to i32
    %c0_i32_0 = arith.constant 0 : i32
    %2 = arith.cmpi ne, %1, %c0_i32_0 : i32
    scf.if %2 {
      %cst_160 = arith.constant 0.000000e+00 : f32
      %469 = vector.broadcast %cst_160 : f32 to vector<8x128xf32>
      %c0_161 = arith.constant 0 : index
      %c0_162 = arith.constant 0 : index
      %470 = vector.load %arg10[%c0_161, %c0_162] : memref<8x128xf32, #tpu.memory_space<vmem>>, vector<8x128xf32>
      tpu.vector_store %arg10[%c0_161, %c0_162], %469 {strides = array<i32>} : memref<8x128xf32, #tpu.memory_space<vmem>>, vector<8x128xf32>,
    } else {
    }
    %cst = arith.constant 0.000000e+00 : f32
    %3 = vector.broadcast %cst : f32 to vector<8x128xf32>
    %c0_i32_1 = arith.constant 0 : i32
    %c8_i32 = arith.constant 8 : i32
    %4 = arith.muli %c0_i32_1, %c8_i32 : i32
    %5 = tpu.assume_multiple %4, 8 : i32
    %6 = arith.index_cast %5 : i32 to index
    %c0 = arith.constant 0 : index
    %7 = vector.load %arg2[%6, %c0] : memref<8x128xf32, #tpu.memory_space<vmem>>, vector<8x128xf32>
    %8 = arith.index_cast %5 : i32 to index
    %c0_2 = arith.constant 0 : index
    %9 = vector.load %arg3[%8, %c0_2] : memref<8x128xf32, #tpu.memory_space<vmem>>, vector<8x128xf32>
    %10 = arith.index_cast %5 : i32 to index
    %c0_3 = arith.constant 0 : index
    %11 = vector.load %arg4[%10, %c0_3] : memref<8x128xf32, #tpu.memory_space<vmem>>, vector<8x128xf32>
    %cst_4 = arith.constant 1.000000e+06 : f32
    %12 = vector.broadcast %cst_4 : f32 to vector<8x128xf32>
    %13 = arith.minimumf %9, %12 : vector<8x128xf32>
    %cst_5 = arith.constant 1.000000e-10 : f32
    %14 = vector.broadcast %cst_5 : f32 to vector<8x128xf32>
    %15 = arith.addf %13, %14 : vector<8x128xf32>
    %16 = math.log %15 : vector<8x128xf32>
    %17 = arith.addf %13, %7 : vector<8x128xf32>
    %cst_6 = arith.constant 1.000000e-10 : f32
    %18 = vector.broadcast %cst_6 : f32 to vector<8x128xf32>
    %19 = arith.addf %17, %18 : vector<8x128xf32>
    %20 = math.log %19 : vector<8x128xf32>
    %cst_7 = arith.constant 1.000000e-10 : f32
    %21 = vector.broadcast %cst_7 : f32 to vector<8x128xf32>
    %22 = arith.addf %7, %21 : vector<8x128xf32>
    %23 = math.log %22 : vector<8x128xf32>
    %cst_8 = arith.constant 1.000000e-10 : f32
    %24 = vector.broadcast %cst_8 : f32 to vector<8x128xf32>
    %25 = arith.addf %13, %24 : vector<8x128xf32>
    %cst_9 = arith.constant 1.000000e+00 : f32
    %26 = vector.broadcast %cst_9 : f32 to vector<8x128xf32>
    %cst_10 = arith.constant 5.000000e+00 : f32
    %27 = vector.broadcast %cst_10 : f32 to vector<8x128xf32>
    %28 = arith.cmpf olt, %25, %27 : vector<8x128xf32>
    %cst_11 = arith.constant 1.000000e+00 : f32
    %29 = vector.broadcast %cst_11 : f32 to vector<8x128xf32>
    %30 = arith.select %28, %25, %29 : vector<8x128xi1>, vector<8x128xf32>
    %31 = arith.mulf %26, %30 : vector<8x128xf32>
    %cst_12 = arith.constant 1.000000e+00 : f32
    %32 = vector.broadcast %cst_12 : f32 to vector<8x128xf32>
    %33 = arith.addf %25, %32 : vector<8x128xf32>
    %34 = arith.select %28, %33, %25 : vector<8x128xi1>, vector<8x128xf32>
    %cst_13 = arith.constant 5.000000e+00 : f32
    %35 = vector.broadcast %cst_13 : f32 to vector<8x128xf32>
    %36 = arith.cmpf olt, %34, %35 : vector<8x128xf32>
    %cst_14 = arith.constant 1.000000e+00 : f32
    %37 = vector.broadcast %cst_14 : f32 to vector<8x128xf32>
    %38 = arith.select %36, %34, %37 : vector<8x128xi1>, vector<8x128xf32>
    %39 = arith.mulf %31, %38 : vector<8x128xf32>
    %cst_15 = arith.constant 1.000000e+00 : f32
    %40 = vector.broadcast %cst_15 : f32 to vector<8x128xf32>
    %41 = arith.addf %34, %40 : vector<8x128xf32>
    %42 = arith.select %36, %41, %34 : vector<8x128xi1>, vector<8x128xf32>
    %cst_16 = arith.constant 5.000000e+00 : f32
    %43 = vector.broadcast %cst_16 : f32 to vector<8x128xf32>
    %44 = arith.cmpf olt, %42, %43 : vector<8x128xf32>
    %cst_17 = arith.constant 1.000000e+00 : f32
    %45 = vector.broadcast %cst_17 : f32 to vector<8x128xf32>
    %46 = arith.select %44, %42, %45 : vector<8x128xi1>, vector<8x128xf32>
    %47 = arith.mulf %39, %46 : vector<8x128xf32>
    %cst_18 = arith.constant 1.000000e+00 : f32
    %48 = vector.broadcast %cst_18 : f32 to vector<8x128xf32>
    %49 = arith.addf %42, %48 : vector<8x128xf32>
    %50 = arith.select %44, %49, %42 : vector<8x128xi1>, vector<8x128xf32>
    %cst_19 = arith.constant 5.000000e+00 : f32
    %51 = vector.broadcast %cst_19 : f32 to vector<8x128xf32>
    %52 = arith.cmpf olt, %50, %51 : vector<8x128xf32>
    %cst_20 = arith.constant 1.000000e+00 : f32
    %53 = vector.broadcast %cst_20 : f32 to vector<8x128xf32>
    %54 = arith.select %52, %50, %53 : vector<8x128xi1>, vector<8x128xf32>
    %55 = arith.mulf %47, %54 : vector<8x128xf32>
    %cst_21 = arith.constant 1.000000e+00 : f32
    %56 = vector.broadcast %cst_21 : f32 to vector<8x128xf32>
    %57 = arith.addf %50, %56 : vector<8x128xf32>
    %58 = arith.select %52, %57, %50 : vector<8x128xi1>, vector<8x128xf32>
    %cst_22 = arith.constant 5.000000e+00 : f32
    %59 = vector.broadcast %cst_22 : f32 to vector<8x128xf32>
    %60 = arith.cmpf olt, %58, %59 : vector<8x128xf32>
    %cst_23 = arith.constant 1.000000e+00 : f32
    %61 = vector.broadcast %cst_23 : f32 to vector<8x128xf32>
    %62 = arith.select %60, %58, %61 : vector<8x128xi1>, vector<8x128xf32>
    %63 = arith.mulf %55, %62 : vector<8x128xf32>
    %cst_24 = arith.constant 1.000000e+00 : f32
    %64 = vector.broadcast %cst_24 : f32 to vector<8x128xf32>
    %65 = arith.addf %58, %64 : vector<8x128xf32>
    %66 = arith.select %60, %65, %58 : vector<8x128xi1>, vector<8x128xf32>
    %67 = tpu.reciprocal %66 {approx = true} : vector<8x128xf32> -> vector<8x128xf32>
    %68 = arith.mulf %67, %67 : vector<8x128xf32>
    %cst_25 = arith.constant 7.93650805E-4 : f32
    %69 = vector.broadcast %cst_25 : f32 to vector<8x128xf32>
    %70 = arith.mulf %68, %69 : vector<8x128xf32>
    %cst_26 = arith.constant -0.00277777785 : f32
    %71 = vector.broadcast %cst_26 : f32 to vector<8x128xf32>
    %72 = arith.addf %71, %70 : vector<8x128xf32>
    %73 = arith.mulf %68, %72 : vector<8x128xf32>
    %cst_27 = arith.constant 0.0833333358 : f32
    %74 = vector.broadcast %cst_27 : f32 to vector<8x128xf32>
    %75 = arith.addf %74, %73 : vector<8x128xf32>
    %76 = arith.mulf %67, %75 : vector<8x128xf32>
    %cst_28 = arith.constant 5.000000e-01 : f32
    %77 = vector.broadcast %cst_28 : f32 to vector<8x128xf32>
    %78 = arith.subf %66, %77 : vector<8x128xf32>
    %79 = math.log %66 : vector<8x128xf32>
    %80 = arith.mulf %78, %79 : vector<8x128xf32>
    %81 = arith.subf %80, %66 : vector<8x128xf32>
    %cst_29 = arith.constant 0.918938517 : f32
    %82 = vector.broadcast %cst_29 : f32 to vector<8x128xf32>
    %83 = arith.addf %81, %82 : vector<8x128xf32>
    %84 = arith.addf %83, %76 : vector<8x128xf32>
    %cst_30 = arith.constant 1.000000e+00 : f32
    %85 = vector.broadcast %cst_30 : f32 to vector<8x128xf32>
    %86 = arith.addf %11, %85 : vector<8x128xf32>
    %cst_31 = arith.constant 1.000000e+00 : f32
    %87 = vector.broadcast %cst_31 : f32 to vector<8x128xf32>
    %cst_32 = arith.constant 5.000000e+00 : f32
    %88 = vector.broadcast %cst_32 : f32 to vector<8x128xf32>
    %89 = arith.cmpf olt, %86, %88 : vector<8x128xf32>
    %cst_33 = arith.constant 1.000000e+00 : f32
    %90 = vector.broadcast %cst_33 : f32 to vector<8x128xf32>
    %91 = arith.select %89, %86, %90 : vector<8x128xi1>, vector<8x128xf32>
    %92 = arith.mulf %87, %91 : vector<8x128xf32>
    %cst_34 = arith.constant 1.000000e+00 : f32
    %93 = vector.broadcast %cst_34 : f32 to vector<8x128xf32>
    %94 = arith.addf %86, %93 : vector<8x128xf32>
    %95 = arith.select %89, %94, %86 : vector<8x128xi1>, vector<8x128xf32>
    %cst_35 = arith.constant 5.000000e+00 : f32
    %96 = vector.broadcast %cst_35 : f32 to vector<8x128xf32>
    %97 = arith.cmpf olt, %95, %96 : vector<8x128xf32>
    %cst_36 = arith.constant 1.000000e+00 : f32
    %98 = vector.broadcast %cst_36 : f32 to vector<8x128xf32>
    %99 = arith.select %97, %95, %98 : vector<8x128xi1>, vector<8x128xf32>
    %100 = arith.mulf %92, %99 : vector<8x128xf32>
    %cst_37 = arith.constant 1.000000e+00 : f32
    %101 = vector.broadcast %cst_37 : f32 to vector<8x128xf32>
    %102 = arith.addf %95, %101 : vector<8x128xf32>
    %103 = arith.select %97, %102, %95 : vector<8x128xi1>, vector<8x128xf32>
    %cst_38 = arith.constant 5.000000e+00 : f32
    %104 = vector.broadcast %cst_38 : f32 to vector<8x128xf32>
    %105 = arith.cmpf olt, %103, %104 : vector<8x128xf32>
    %cst_39 = arith.constant 1.000000e+00 : f32
    %106 = vector.broadcast %cst_39 : f32 to vector<8x128xf32>
    %107 = arith.select %105, %103, %106 : vector<8x128xi1>, vector<8x128xf32>
    %108 = arith.mulf %100, %107 : vector<8x128xf32>
    %cst_40 = arith.constant 1.000000e+00 : f32
    %109 = vector.broadcast %cst_40 : f32 to vector<8x128xf32>
    %110 = arith.addf %103, %109 : vector<8x128xf32>
    %111 = arith.select %105, %110, %103 : vector<8x128xi1>, vector<8x128xf32>
    %cst_41 = arith.constant 5.000000e+00 : f32
    %112 = vector.broadcast %cst_41 : f32 to vector<8x128xf32>
    %113 = arith.cmpf olt, %111, %112 : vector<8x128xf32>
    %cst_42 = arith.constant 1.000000e+00 : f32
    %114 = vector.broadcast %cst_42 : f32 to vector<8x128xf32>
    %115 = arith.select %113, %111, %114 : vector<8x128xi1>, vector<8x128xf32>
    %116 = arith.mulf %108, %115 : vector<8x128xf32>
    %cst_43 = arith.constant 1.000000e+00 : f32
    %117 = vector.broadcast %cst_43 : f32 to vector<8x128xf32>
    %118 = arith.addf %111, %117 : vector<8x128xf32>
    %119 = arith.select %113, %118, %111 : vector<8x128xi1>, vector<8x128xf32>
    %cst_44 = arith.constant 5.000000e+00 : f32
    %120 = vector.broadcast %cst_44 : f32 to vector<8x128xf32>
    %121 = arith.cmpf olt, %119, %120 : vector<8x128xf32>
    %cst_45 = arith.constant 1.000000e+00 : f32
    %122 = vector.broadcast %cst_45 : f32 to vector<8x128xf32>
    %123 = arith.select %121, %119, %122 : vector<8x128xi1>, vector<8x128xf32>
    %124 = arith.mulf %116, %123 : vector<8x128xf32>
    %cst_46 = arith.constant 1.000000e+00 : f32
    %125 = vector.broadcast %cst_46 : f32 to vector<8x128xf32>
    %126 = arith.addf %119, %125 : vector<8x128xf32>
    %127 = arith.select %121, %126, %119 : vector<8x128xi1>, vector<8x128xf32>
    %128 = tpu.reciprocal %127 {approx = true} : vector<8x128xf32> -> vector<8x128xf32>
    %129 = arith.mulf %128, %128 : vector<8x128xf32>
    %cst_47 = arith.constant 7.93650805E-4 : f32
    %130 = vector.broadcast %cst_47 : f32 to vector<8x128xf32>
    %131 = arith.mulf %129, %130 : vector<8x128xf32>
    %cst_48 = arith.constant -0.00277777785 : f32
    %132 = vector.broadcast %cst_48 : f32 to vector<8x128xf32>
    %133 = arith.addf %132, %131 : vector<8x128xf32>
    %134 = arith.mulf %129, %133 : vector<8x128xf32>
    %cst_49 = arith.constant 0.0833333358 : f32
    %135 = vector.broadcast %cst_49 : f32 to vector<8x128xf32>
    %136 = arith.addf %135, %134 : vector<8x128xf32>
    %137 = arith.mulf %128, %136 : vector<8x128xf32>
    %cst_50 = arith.constant 5.000000e-01 : f32
    %138 = vector.broadcast %cst_50 : f32 to vector<8x128xf32>
    %139 = arith.subf %127, %138 : vector<8x128xf32>
    %140 = math.log %127 : vector<8x128xf32>
    %141 = arith.mulf %139, %140 : vector<8x128xf32>
    %142 = arith.subf %141, %127 : vector<8x128xf32>
    %cst_51 = arith.constant 0.918938517 : f32
    %143 = vector.broadcast %cst_51 : f32 to vector<8x128xf32>
    %144 = arith.addf %142, %143 : vector<8x128xf32>
    %145 = arith.addf %144, %137 : vector<8x128xf32>
    %146 = arith.addf %11, %13 : vector<8x128xf32>
    %cst_52 = arith.constant 1.000000e-10 : f32
    %147 = vector.broadcast %cst_52 : f32 to vector<8x128xf32>
    %148 = arith.addf %146, %147 : vector<8x128xf32>
    %cst_53 = arith.constant 1.000000e+00 : f32
    %149 = vector.broadcast %cst_53 : f32 to vector<8x128xf32>
    %cst_54 = arith.constant 5.000000e+00 : f32
    %150 = vector.broadcast %cst_54 : f32 to vector<8x128xf32>
    %151 = arith.cmpf olt, %148, %150 : vector<8x128xf32>
    %cst_55 = arith.constant 1.000000e+00 : f32
    %152 = vector.broadcast %cst_55 : f32 to vector<8x128xf32>
    %153 = arith.select %151, %148, %152 : vector<8x128xi1>, vector<8x128xf32>
    %154 = arith.mulf %149, %153 : vector<8x128xf32>
    %cst_56 = arith.constant 1.000000e+00 : f32
    %155 = vector.broadcast %cst_56 : f32 to vector<8x128xf32>
    %156 = arith.addf %148, %155 : vector<8x128xf32>
    %157 = arith.select %151, %156, %148 : vector<8x128xi1>, vector<8x128xf32>
    %cst_57 = arith.constant 5.000000e+00 : f32
    %158 = vector.broadcast %cst_57 : f32 to vector<8x128xf32>
    %159 = arith.cmpf olt, %157, %158 : vector<8x128xf32>
    %cst_58 = arith.constant 1.000000e+00 : f32
    %160 = vector.broadcast %cst_58 : f32 to vector<8x128xf32>
    %161 = arith.select %159, %157, %160 : vector<8x128xi1>, vector<8x128xf32>
    %162 = arith.mulf %154, %161 : vector<8x128xf32>
    %cst_59 = arith.constant 1.000000e+00 : f32
    %163 = vector.broadcast %cst_59 : f32 to vector<8x128xf32>
    %164 = arith.addf %157, %163 : vector<8x128xf32>
    %165 = arith.select %159, %164, %157 : vector<8x128xi1>, vector<8x128xf32>
    %cst_60 = arith.constant 5.000000e+00 : f32
    %166 = vector.broadcast %cst_60 : f32 to vector<8x128xf32>
    %167 = arith.cmpf olt, %165, %166 : vector<8x128xf32>
    %cst_61 = arith.constant 1.000000e+00 : f32
    %168 = vector.broadcast %cst_61 : f32 to vector<8x128xf32>
    %169 = arith.select %167, %165, %168 : vector<8x128xi1>, vector<8x128xf32>
    %170 = arith.mulf %162, %169 : vector<8x128xf32>
    %cst_62 = arith.constant 1.000000e+00 : f32
    %171 = vector.broadcast %cst_62 : f32 to vector<8x128xf32>
    %172 = arith.addf %165, %171 : vector<8x128xf32>
    %173 = arith.select %167, %172, %165 : vector<8x128xi1>, vector<8x128xf32>
    %cst_63 = arith.constant 5.000000e+00 : f32
    %174 = vector.broadcast %cst_63 : f32 to vector<8x128xf32>
    %175 = arith.cmpf olt, %173, %174 : vector<8x128xf32>
    %cst_64 = arith.constant 1.000000e+00 : f32
    %176 = vector.broadcast %cst_64 : f32 to vector<8x128xf32>
    %177 = arith.select %175, %173, %176 : vector<8x128xi1>, vector<8x128xf32>
    %178 = arith.mulf %170, %177 : vector<8x128xf32>
    %cst_65 = arith.constant 1.000000e+00 : f32
    %179 = vector.broadcast %cst_65 : f32 to vector<8x128xf32>
    %180 = arith.addf %173, %179 : vector<8x128xf32>
    %181 = arith.select %175, %180, %173 : vector<8x128xi1>, vector<8x128xf32>
    %cst_66 = arith.constant 5.000000e+00 : f32
    %182 = vector.broadcast %cst_66 : f32 to vector<8x128xf32>
    %183 = arith.cmpf olt, %181, %182 : vector<8x128xf32>
    %cst_67 = arith.constant 1.000000e+00 : f32
    %184 = vector.broadcast %cst_67 : f32 to vector<8x128xf32>
    %185 = arith.select %183, %181, %184 : vector<8x128xi1>, vector<8x128xf32>
    %186 = arith.mulf %178, %185 : vector<8x128xf32>
    %cst_68 = arith.constant 1.000000e+00 : f32
    %187 = vector.broadcast %cst_68 : f32 to vector<8x128xf32>
    %188 = arith.addf %181, %187 : vector<8x128xf32>
    %189 = arith.select %183, %188, %181 : vector<8x128xi1>, vector<8x128xf32>
    %190 = tpu.reciprocal %189 {approx = true} : vector<8x128xf32> -> vector<8x128xf32>
    %191 = arith.mulf %190, %190 : vector<8x128xf32>
    %cst_69 = arith.constant 7.93650805E-4 : f32
    %192 = vector.broadcast %cst_69 : f32 to vector<8x128xf32>
    %193 = arith.mulf %191, %192 : vector<8x128xf32>
    %cst_70 = arith.constant -0.00277777785 : f32
    %194 = vector.broadcast %cst_70 : f32 to vector<8x128xf32>
    %195 = arith.addf %194, %193 : vector<8x128xf32>
    %196 = arith.mulf %191, %195 : vector<8x128xf32>
    %cst_71 = arith.constant 0.0833333358 : f32
    %197 = vector.broadcast %cst_71 : f32 to vector<8x128xf32>
    %198 = arith.addf %197, %196 : vector<8x128xf32>
    %199 = arith.mulf %190, %198 : vector<8x128xf32>
    %cst_72 = arith.constant 5.000000e-01 : f32
    %200 = vector.broadcast %cst_72 : f32 to vector<8x128xf32>
    %201 = arith.subf %189, %200 : vector<8x128xf32>
    %202 = math.log %189 : vector<8x128xf32>
    %203 = arith.mulf %201, %202 : vector<8x128xf32>
    %204 = arith.subf %203, %189 : vector<8x128xf32>
    %cst_73 = arith.constant 0.918938517 : f32
    %205 = vector.broadcast %cst_73 : f32 to vector<8x128xf32>
    %206 = arith.addf %204, %205 : vector<8x128xf32>
    %207 = arith.addf %206, %199 : vector<8x128xf32>
    %208 = arith.addf %84, %145 : vector<8x128xf32>
    %209 = arith.subf %208, %207 : vector<8x128xf32>
    %210 = arith.mulf %63, %124 : vector<8x128xf32>
    %211 = math.log %210 : vector<8x128xf32>
    %212 = arith.subf %209, %211 : vector<8x128xf32>
    %213 = math.log %186 : vector<8x128xf32>
    %214 = arith.addf %212, %213 : vector<8x128xf32>
    %215 = arith.addf %13, %11 : vector<8x128xf32>
    %216 = arith.subf %20, %16 : vector<8x128xf32>
    %217 = arith.mulf %215, %216 : vector<8x128xf32>
    %218 = arith.subf %16, %23 : vector<8x128xf32>
    %219 = arith.mulf %11, %218 : vector<8x128xf32>
    %220 = arith.addf %217, %219 : vector<8x128xf32>
    %221 = arith.addf %214, %220 : vector<8x128xf32>
    %222 = arith.index_cast %5 : i32 to index
    %c0_74 = arith.constant 0 : index
    %223 = vector.load %arg5[%222, %c0_74] : memref<8x128xf32, #tpu.memory_space<vmem>>, vector<8x128xf32>
    %224 = arith.index_cast %5 : i32 to index
    %c0_75 = arith.constant 0 : index
    %225 = vector.load %arg8[%224, %c0_75] : memref<8x128xf32, #tpu.memory_space<vmem>>, vector<8x128xf32>
    %226 = arith.index_cast %5 : i32 to index
    %c0_76 = arith.constant 0 : index
    %227 = vector.load %arg7[%226, %c0_76] : memref<8x128xf32, #tpu.memory_space<vmem>>, vector<8x128xf32>
    %228 = arith.index_cast %5 : i32 to index
    %c0_77 = arith.constant 0 : index
    %229 = vector.load %arg6[%228, %c0_77] : memref<8x128xf32, #tpu.memory_space<vmem>>, vector<8x128xf32>
    %cst_78 = arith.constant 1.000000e+06 : f32
    %230 = vector.broadcast %cst_78 : f32 to vector<8x128xf32>
    %231 = arith.minimumf %229, %230 : vector<8x128xf32>
    %cst_79 = arith.constant 1.000000e-10 : f32
    %232 = vector.broadcast %cst_79 : f32 to vector<8x128xf32>
    %233 = arith.addf %231, %232 : vector<8x128xf32>
    %234 = math.log %233 : vector<8x128xf32>
    %235 = arith.addf %231, %223 : vector<8x128xf32>
    %cst_80 = arith.constant 1.000000e-10 : f32
    %236 = vector.broadcast %cst_80 : f32 to vector<8x128xf32>
    %237 = arith.addf %235, %236 : vector<8x128xf32>
    %238 = math.log %237 : vector<8x128xf32>
    %cst_81 = arith.constant 1.000000e-10 : f32
    %239 = vector.broadcast %cst_81 : f32 to vector<8x128xf32>
    %240 = arith.addf %223, %239 : vector<8x128xf32>
    %241 = math.log %240 : vector<8x128xf32>
    %cst_82 = arith.constant 1.000000e-10 : f32
    %242 = vector.broadcast %cst_82 : f32 to vector<8x128xf32>
    %243 = arith.addf %231, %242 : vector<8x128xf32>
    %cst_83 = arith.constant 1.000000e+00 : f32
    %244 = vector.broadcast %cst_83 : f32 to vector<8x128xf32>
    %cst_84 = arith.constant 5.000000e+00 : f32
    %245 = vector.broadcast %cst_84 : f32 to vector<8x128xf32>
    %246 = arith.cmpf olt, %243, %245 : vector<8x128xf32>
    %cst_85 = arith.constant 1.000000e+00 : f32
    %247 = vector.broadcast %cst_85 : f32 to vector<8x128xf32>
    %248 = arith.select %246, %243, %247 : vector<8x128xi1>, vector<8x128xf32>
    %249 = arith.mulf %244, %248 : vector<8x128xf32>
    %cst_86 = arith.constant 1.000000e+00 : f32
    %250 = vector.broadcast %cst_86 : f32 to vector<8x128xf32>
    %251 = arith.addf %243, %250 : vector<8x128xf32>
    %252 = arith.select %246, %251, %243 : vector<8x128xi1>, vector<8x128xf32>
    %cst_87 = arith.constant 5.000000e+00 : f32
    %253 = vector.broadcast %cst_87 : f32 to vector<8x128xf32>
    %254 = arith.cmpf olt, %252, %253 : vector<8x128xf32>
    %cst_88 = arith.constant 1.000000e+00 : f32
    %255 = vector.broadcast %cst_88 : f32 to vector<8x128xf32>
    %256 = arith.select %254, %252, %255 : vector<8x128xi1>, vector<8x128xf32>
    %257 = arith.mulf %249, %256 : vector<8x128xf32>
    %cst_89 = arith.constant 1.000000e+00 : f32
    %258 = vector.broadcast %cst_89 : f32 to vector<8x128xf32>
    %259 = arith.addf %252, %258 : vector<8x128xf32>
    %260 = arith.select %254, %259, %252 : vector<8x128xi1>, vector<8x128xf32>
    %cst_90 = arith.constant 5.000000e+00 : f32
    %261 = vector.broadcast %cst_90 : f32 to vector<8x128xf32>
    %262 = arith.cmpf olt, %260, %261 : vector<8x128xf32>
    %cst_91 = arith.constant 1.000000e+00 : f32
    %263 = vector.broadcast %cst_91 : f32 to vector<8x128xf32>
    %264 = arith.select %262, %260, %263 : vector<8x128xi1>, vector<8x128xf32>
    %265 = arith.mulf %257, %264 : vector<8x128xf32>
    %cst_92 = arith.constant 1.000000e+00 : f32
    %266 = vector.broadcast %cst_92 : f32 to vector<8x128xf32>
    %267 = arith.addf %260, %266 : vector<8x128xf32>
    %268 = arith.select %262, %267, %260 : vector<8x128xi1>, vector<8x128xf32>
    %cst_93 = arith.constant 5.000000e+00 : f32
    %269 = vector.broadcast %cst_93 : f32 to vector<8x128xf32>
    %270 = arith.cmpf olt, %268, %269 : vector<8x128xf32>
    %cst_94 = arith.constant 1.000000e+00 : f32
    %271 = vector.broadcast %cst_94 : f32 to vector<8x128xf32>
    %272 = arith.select %270, %268, %271 : vector<8x128xi1>, vector<8x128xf32>
    %273 = arith.mulf %265, %272 : vector<8x128xf32>
    %cst_95 = arith.constant 1.000000e+00 : f32
    %274 = vector.broadcast %cst_95 : f32 to vector<8x128xf32>
    %275 = arith.addf %268, %274 : vector<8x128xf32>
    %276 = arith.select %270, %275, %268 : vector<8x128xi1>, vector<8x128xf32>
    %cst_96 = arith.constant 5.000000e+00 : f32
    %277 = vector.broadcast %cst_96 : f32 to vector<8x128xf32>
    %278 = arith.cmpf olt, %276, %277 : vector<8x128xf32>
    %cst_97 = arith.constant 1.000000e+00 : f32
    %279 = vector.broadcast %cst_97 : f32 to vector<8x128xf32>
    %280 = arith.select %278, %276, %279 : vector<8x128xi1>, vector<8x128xf32>
    %281 = arith.mulf %273, %280 : vector<8x128xf32>
    %cst_98 = arith.constant 1.000000e+00 : f32
    %282 = vector.broadcast %cst_98 : f32 to vector<8x128xf32>
    %283 = arith.addf %276, %282 : vector<8x128xf32>
    %284 = arith.select %278, %283, %276 : vector<8x128xi1>, vector<8x128xf32>
    %285 = tpu.reciprocal %284 {approx = true} : vector<8x128xf32> -> vector<8x128xf32>
    %286 = arith.mulf %285, %285 : vector<8x128xf32>
    %cst_99 = arith.constant 7.93650805E-4 : f32
    %287 = vector.broadcast %cst_99 : f32 to vector<8x128xf32>
    %288 = arith.mulf %286, %287 : vector<8x128xf32>
    %cst_100 = arith.constant -0.00277777785 : f32
    %289 = vector.broadcast %cst_100 : f32 to vector<8x128xf32>
    %290 = arith.addf %289, %288 : vector<8x128xf32>
    %291 = arith.mulf %286, %290 : vector<8x128xf32>
    %cst_101 = arith.constant 0.0833333358 : f32
    %292 = vector.broadcast %cst_101 : f32 to vector<8x128xf32>
    %293 = arith.addf %292, %291 : vector<8x128xf32>
    %294 = arith.mulf %285, %293 : vector<8x128xf32>
    %cst_102 = arith.constant 5.000000e-01 : f32
    %295 = vector.broadcast %cst_102 : f32 to vector<8x128xf32>
    %296 = arith.subf %284, %295 : vector<8x128xf32>
    %297 = math.log %284 : vector<8x128xf32>
    %298 = arith.mulf %296, %297 : vector<8x128xf32>
    %299 = arith.subf %298, %284 : vector<8x128xf32>
    %cst_103 = arith.constant 0.918938517 : f32
    %300 = vector.broadcast %cst_103 : f32 to vector<8x128xf32>
    %301 = arith.addf %299, %300 : vector<8x128xf32>
    %302 = arith.addf %301, %294 : vector<8x128xf32>
    %cst_104 = arith.constant 1.000000e+00 : f32
    %303 = vector.broadcast %cst_104 : f32 to vector<8x128xf32>
    %304 = arith.addf %225, %303 : vector<8x128xf32>
    %cst_105 = arith.constant 1.000000e+00 : f32
    %305 = vector.broadcast %cst_105 : f32 to vector<8x128xf32>
    %cst_106 = arith.constant 5.000000e+00 : f32
    %306 = vector.broadcast %cst_106 : f32 to vector<8x128xf32>
    %307 = arith.cmpf olt, %304, %306 : vector<8x128xf32>
    %cst_107 = arith.constant 1.000000e+00 : f32
    %308 = vector.broadcast %cst_107 : f32 to vector<8x128xf32>
    %309 = arith.select %307, %304, %308 : vector<8x128xi1>, vector<8x128xf32>
    %310 = arith.mulf %305, %309 : vector<8x128xf32>
    %cst_108 = arith.constant 1.000000e+00 : f32
    %311 = vector.broadcast %cst_108 : f32 to vector<8x128xf32>
    %312 = arith.addf %304, %311 : vector<8x128xf32>
    %313 = arith.select %307, %312, %304 : vector<8x128xi1>, vector<8x128xf32>
    %cst_109 = arith.constant 5.000000e+00 : f32
    %314 = vector.broadcast %cst_109 : f32 to vector<8x128xf32>
    %315 = arith.cmpf olt, %313, %314 : vector<8x128xf32>
    %cst_110 = arith.constant 1.000000e+00 : f32
    %316 = vector.broadcast %cst_110 : f32 to vector<8x128xf32>
    %317 = arith.select %315, %313, %316 : vector<8x128xi1>, vector<8x128xf32>
    %318 = arith.mulf %310, %317 : vector<8x128xf32>
    %cst_111 = arith.constant 1.000000e+00 : f32
    %319 = vector.broadcast %cst_111 : f32 to vector<8x128xf32>
    %320 = arith.addf %313, %319 : vector<8x128xf32>
    %321 = arith.select %315, %320, %313 : vector<8x128xi1>, vector<8x128xf32>
    %cst_112 = arith.constant 5.000000e+00 : f32
    %322 = vector.broadcast %cst_112 : f32 to vector<8x128xf32>
    %323 = arith.cmpf olt, %321, %322 : vector<8x128xf32>
    %cst_113 = arith.constant 1.000000e+00 : f32
    %324 = vector.broadcast %cst_113 : f32 to vector<8x128xf32>
    %325 = arith.select %323, %321, %324 : vector<8x128xi1>, vector<8x128xf32>
    %326 = arith.mulf %318, %325 : vector<8x128xf32>
    %cst_114 = arith.constant 1.000000e+00 : f32
    %327 = vector.broadcast %cst_114 : f32 to vector<8x128xf32>
    %328 = arith.addf %321, %327 : vector<8x128xf32>
    %329 = arith.select %323, %328, %321 : vector<8x128xi1>, vector<8x128xf32>
    %cst_115 = arith.constant 5.000000e+00 : f32
    %330 = vector.broadcast %cst_115 : f32 to vector<8x128xf32>
    %331 = arith.cmpf olt, %329, %330 : vector<8x128xf32>
    %cst_116 = arith.constant 1.000000e+00 : f32
    %332 = vector.broadcast %cst_116 : f32 to vector<8x128xf32>
    %333 = arith.select %331, %329, %332 : vector<8x128xi1>, vector<8x128xf32>
    %334 = arith.mulf %326, %333 : vector<8x128xf32>
    %cst_117 = arith.constant 1.000000e+00 : f32
    %335 = vector.broadcast %cst_117 : f32 to vector<8x128xf32>
    %336 = arith.addf %329, %335 : vector<8x128xf32>
    %337 = arith.select %331, %336, %329 : vector<8x128xi1>, vector<8x128xf32>
    %cst_118 = arith.constant 5.000000e+00 : f32
    %338 = vector.broadcast %cst_118 : f32 to vector<8x128xf32>
    %339 = arith.cmpf olt, %337, %338 : vector<8x128xf32>
    %cst_119 = arith.constant 1.000000e+00 : f32
    %340 = vector.broadcast %cst_119 : f32 to vector<8x128xf32>
    %341 = arith.select %339, %337, %340 : vector<8x128xi1>, vector<8x128xf32>
    %342 = arith.mulf %334, %341 : vector<8x128xf32>
    %cst_120 = arith.constant 1.000000e+00 : f32
    %343 = vector.broadcast %cst_120 : f32 to vector<8x128xf32>
    %344 = arith.addf %337, %343 : vector<8x128xf32>
    %345 = arith.select %339, %344, %337 : vector<8x128xi1>, vector<8x128xf32>
    %346 = tpu.reciprocal %345 {approx = true} : vector<8x128xf32> -> vector<8x128xf32>
    %347 = arith.mulf %346, %346 : vector<8x128xf32>
    %cst_121 = arith.constant 7.93650805E-4 : f32
    %348 = vector.broadcast %cst_121 : f32 to vector<8x128xf32>
    %349 = arith.mulf %347, %348 : vector<8x128xf32>
    %cst_122 = arith.constant -0.00277777785 : f32
    %350 = vector.broadcast %cst_122 : f32 to vector<8x128xf32>
    %351 = arith.addf %350, %349 : vector<8x128xf32>
    %352 = arith.mulf %347, %351 : vector<8x128xf32>
    %cst_123 = arith.constant 0.0833333358 : f32
    %353 = vector.broadcast %cst_123 : f32 to vector<8x128xf32>
    %354 = arith.addf %353, %352 : vector<8x128xf32>
    %355 = arith.mulf %346, %354 : vector<8x128xf32>
    %cst_124 = arith.constant 5.000000e-01 : f32
    %356 = vector.broadcast %cst_124 : f32 to vector<8x128xf32>
    %357 = arith.subf %345, %356 : vector<8x128xf32>
    %358 = math.log %345 : vector<8x128xf32>
    %359 = arith.mulf %357, %358 : vector<8x128xf32>
    %360 = arith.subf %359, %345 : vector<8x128xf32>
    %cst_125 = arith.constant 0.918938517 : f32
    %361 = vector.broadcast %cst_125 : f32 to vector<8x128xf32>
    %362 = arith.addf %360, %361 : vector<8x128xf32>
    %363 = arith.addf %362, %355 : vector<8x128xf32>
    %364 = arith.addf %225, %231 : vector<8x128xf32>
    %cst_126 = arith.constant 1.000000e-10 : f32
    %365 = vector.broadcast %cst_126 : f32 to vector<8x128xf32>
    %366 = arith.addf %364, %365 : vector<8x128xf32>
    %cst_127 = arith.constant 1.000000e+00 : f32
    %367 = vector.broadcast %cst_127 : f32 to vector<8x128xf32>
    %cst_128 = arith.constant 5.000000e+00 : f32
    %368 = vector.broadcast %cst_128 : f32 to vector<8x128xf32>
    %369 = arith.cmpf olt, %366, %368 : vector<8x128xf32>
    %cst_129 = arith.constant 1.000000e+00 : f32
    %370 = vector.broadcast %cst_129 : f32 to vector<8x128xf32>
    %371 = arith.select %369, %366, %370 : vector<8x128xi1>, vector<8x128xf32>
    %372 = arith.mulf %367, %371 : vector<8x128xf32>
    %cst_130 = arith.constant 1.000000e+00 : f32
    %373 = vector.broadcast %cst_130 : f32 to vector<8x128xf32>
    %374 = arith.addf %366, %373 : vector<8x128xf32>
    %375 = arith.select %369, %374, %366 : vector<8x128xi1>, vector<8x128xf32>
    %cst_131 = arith.constant 5.000000e+00 : f32
    %376 = vector.broadcast %cst_131 : f32 to vector<8x128xf32>
    %377 = arith.cmpf olt, %375, %376 : vector<8x128xf32>
    %cst_132 = arith.constant 1.000000e+00 : f32
    %378 = vector.broadcast %cst_132 : f32 to vector<8x128xf32>
    %379 = arith.select %377, %375, %378 : vector<8x128xi1>, vector<8x128xf32>
    %380 = arith.mulf %372, %379 : vector<8x128xf32>
    %cst_133 = arith.constant 1.000000e+00 : f32
    %381 = vector.broadcast %cst_133 : f32 to vector<8x128xf32>
    %382 = arith.addf %375, %381 : vector<8x128xf32>
    %383 = arith.select %377, %382, %375 : vector<8x128xi1>, vector<8x128xf32>
    %cst_134 = arith.constant 5.000000e+00 : f32
    %384 = vector.broadcast %cst_134 : f32 to vector<8x128xf32>
    %385 = arith.cmpf olt, %383, %384 : vector<8x128xf32>
    %cst_135 = arith.constant 1.000000e+00 : f32
    %386 = vector.broadcast %cst_135 : f32 to vector<8x128xf32>
    %387 = arith.select %385, %383, %386 : vector<8x128xi1>, vector<8x128xf32>
    %388 = arith.mulf %380, %387 : vector<8x128xf32>
    %cst_136 = arith.constant 1.000000e+00 : f32
    %389 = vector.broadcast %cst_136 : f32 to vector<8x128xf32>
    %390 = arith.addf %383, %389 : vector<8x128xf32>
    %391 = arith.select %385, %390, %383 : vector<8x128xi1>, vector<8x128xf32>
    %cst_137 = arith.constant 5.000000e+00 : f32
    %392 = vector.broadcast %cst_137 : f32 to vector<8x128xf32>
    %393 = arith.cmpf olt, %391, %392 : vector<8x128xf32>
    %cst_138 = arith.constant 1.000000e+00 : f32
    %394 = vector.broadcast %cst_138 : f32 to vector<8x128xf32>
    %395 = arith.select %393, %391, %394 : vector<8x128xi1>, vector<8x128xf32>
    %396 = arith.mulf %388, %395 : vector<8x128xf32>
    %cst_139 = arith.constant 1.000000e+00 : f32
    %397 = vector.broadcast %cst_139 : f32 to vector<8x128xf32>
    %398 = arith.addf %391, %397 : vector<8x128xf32>
    %399 = arith.select %393, %398, %391 : vector<8x128xi1>, vector<8x128xf32>
    %cst_140 = arith.constant 5.000000e+00 : f32
    %400 = vector.broadcast %cst_140 : f32 to vector<8x128xf32>
    %401 = arith.cmpf olt, %399, %400 : vector<8x128xf32>
    %cst_141 = arith.constant 1.000000e+00 : f32
    %402 = vector.broadcast %cst_141 : f32 to vector<8x128xf32>
    %403 = arith.select %401, %399, %402 : vector<8x128xi1>, vector<8x128xf32>
    %404 = arith.mulf %396, %403 : vector<8x128xf32>
    %cst_142 = arith.constant 1.000000e+00 : f32
    %405 = vector.broadcast %cst_142 : f32 to vector<8x128xf32>
    %406 = arith.addf %399, %405 : vector<8x128xf32>
    %407 = arith.select %401, %406, %399 : vector<8x128xi1>, vector<8x128xf32>
    %408 = tpu.reciprocal %407 {approx = true} : vector<8x128xf32> -> vector<8x128xf32>
    %409 = arith.mulf %408, %408 : vector<8x128xf32>
    %cst_143 = arith.constant 7.93650805E-4 : f32
    %410 = vector.broadcast %cst_143 : f32 to vector<8x128xf32>
    %411 = arith.mulf %409, %410 : vector<8x128xf32>
    %cst_144 = arith.constant -0.00277777785 : f32
    %412 = vector.broadcast %cst_144 : f32 to vector<8x128xf32>
    %413 = arith.addf %412, %411 : vector<8x128xf32>
    %414 = arith.mulf %409, %413 : vector<8x128xf32>
    %cst_145 = arith.constant 0.0833333358 : f32
    %415 = vector.broadcast %cst_145 : f32 to vector<8x128xf32>
    %416 = arith.addf %415, %414 : vector<8x128xf32>
    %417 = arith.mulf %408, %416 : vector<8x128xf32>
    %cst_146 = arith.constant 5.000000e-01 : f32
    %418 = vector.broadcast %cst_146 : f32 to vector<8x128xf32>
    %419 = arith.subf %407, %418 : vector<8x128xf32>
    %420 = math.log %407 : vector<8x128xf32>
    %421 = arith.mulf %419, %420 : vector<8x128xf32>
    %422 = arith.subf %421, %407 : vector<8x128xf32>
    %cst_147 = arith.constant 0.918938517 : f32
    %423 = vector.broadcast %cst_147 : f32 to vector<8x128xf32>
    %424 = arith.addf %422, %423 : vector<8x128xf32>
    %425 = arith.addf %424, %417 : vector<8x128xf32>
    %426 = arith.addf %302, %363 : vector<8x128xf32>
    %427 = arith.subf %426, %425 : vector<8x128xf32>
    %428 = arith.mulf %281, %342 : vector<8x128xf32>
    %429 = math.log %428 : vector<8x128xf32>
    %430 = arith.subf %427, %429 : vector<8x128xf32>
    %431 = math.log %404 : vector<8x128xf32>
    %432 = arith.addf %430, %431 : vector<8x128xf32>
    %433 = arith.addf %231, %225 : vector<8x128xf32>
    %434 = arith.subf %238, %234 : vector<8x128xf32>
    %435 = arith.mulf %433, %434 : vector<8x128xf32>
    %436 = arith.subf %234, %241 : vector<8x128xf32>
    %437 = arith.mulf %225, %436 : vector<8x128xf32>
    %438 = arith.addf %435, %437 : vector<8x128xf32>
    %439 = arith.addf %432, %438 : vector<8x128xf32>
    %cst_148 = arith.constant 1.000000e+00 : f32
    %440 = vector.broadcast %cst_148 : f32 to vector<8x128xf32>
    %441 = arith.subf %440, %227 : vector<8x128xf32>
    %cst_149 = arith.constant 1.000000e-10 : f32
    %442 = vector.broadcast %cst_149 : f32 to vector<8x128xf32>
    %443 = arith.addf %441, %442 : vector<8x128xf32>
    %444 = math.log %443 : vector<8x128xf32>
    %445 = arith.subf %439, %444 : vector<8x128xf32>
    %446 = arith.subf %234, %238 : vector<8x128xf32>
    %447 = arith.mulf %231, %446 : vector<8x128xf32>
    %448 = math.exp %447 : vector<8x128xf32>
    %cst_150 = arith.constant 1.000000e+00 : f32
    %449 = vector.broadcast %cst_150 : f32 to vector<8x128xf32>
    %450 = arith.subf %449, %227 : vector<8x128xf32>
    %451 = arith.mulf %450, %448 : vector<8x128xf32>
    %452 = arith.addf %227, %451 : vector<8x128xf32>
    %cst_151 = arith.constant 1.000000e-10 : f32
    %453 = vector.broadcast %cst_151 : f32 to vector<8x128xf32>
    %454 = arith.addf %452, %453 : vector<8x128xf32>
    %455 = math.log %454 : vector<8x128xf32>
    %cst_152 = arith.constant 0.000000e+00 : f32
    %456 = vector.broadcast %cst_152 : f32 to vector<8x128xf32>
    %457 = arith.subf %456, %455 : vector<8x128xf32>
    %cst_153 = arith.constant 9.99999993E-9 : f32
    %458 = vector.broadcast %cst_153 : f32 to vector<8x128xf32>
    %459 = arith.cmpf olt, %225, %458 : vector<8x128xf32>
    %460 = arith.select %459, %457, %445 : vector<8x128xi1>, vector<8x128xf32>
    %461 = arith.addf %221, %460 : vector<8x128xf32>
    %462 = arith.addf %3, %461 : vector<8x128xf32>
    %c1_i32 = arith.constant 1 : i32
    %c0_154 = arith.constant 0 : index
    %c0_155 = arith.constant 0 : index
    %463 = vector.load %arg10[%c0_154, %c0_155] : memref<8x128xf32, #tpu.memory_space<vmem>>, vector<8x128xf32>
    %464 = arith.addf %463, %462 : vector<8x128xf32>
    %c0_156 = arith.constant 0 : index
    %c0_157 = arith.constant 0 : index
    %465 = vector.load %arg10[%c0_156, %c0_157] : memref<8x128xf32, #tpu.memory_space<vmem>>, vector<8x128xf32>
    tpu.vector_store %arg10[%c0_156, %c0_157], %464 {strides = array<i32>} : memref<8x128xf32, #tpu.memory_space<vmem>>, vector<8x128xf32>,
    %c0_i32_158 = arith.constant 0 : i32
    %466 = arith.cmpi eq, %arg1, %c0_i32_158 : i32
    %467 = arith.extui %466 : i1 to i32
    %c0_i32_159 = arith.constant 0 : i32
    %468 = arith.cmpi ne, %467, %c0_i32_159 : i32
    scf.if %468 {
      %c0_160 = arith.constant 0 : index
      %c0_161 = arith.constant 0 : index
      %469 = vector.load %arg10[%c0_160, %c0_161] : memref<8x128xf32, #tpu.memory_space<vmem>>, vector<8x128xf32>
      %cst_162 = arith.constant 9.765625E-4 : f32
      %470 = vector.broadcast %cst_162 : f32 to vector<8x128xf32>
      %471 = arith.mulf %469, %470 : vector<8x128xf32>
      %c0_163 = arith.constant 0 : index
      %c0_164 = arith.constant 0 : index
      %472 = vector.load %arg9[%c0_163, %c0_164] : memref<8x128xf32, #tpu.memory_space<vmem>>, vector<8x128xf32>
      tpu.vector_store %arg9[%c0_163, %c0_164], %471 {strides = array<i32>} : memref<8x128xf32, #tpu.memory_space<vmem>>, vector<8x128xf32>,
    } else {
    }
    return
  }
  func.func @transform_0(%arg0: i32, %arg1: i32) -> (i32, i32) {
    %c1_i32 = arith.constant 1 : i32
    %0 = arith.muli %arg0, %c1_i32 : i32
    %1 = arith.addi %0, %arg1 : i32
    %c0_i32 = arith.constant 0 : i32
    %c0_i32_0 = arith.constant 0 : i32
    return %1, %c0_i32 : i32, i32
  }
  func.func @transform_1(%arg0: i32, %arg1: i32) -> (i32, i32) {
    %c1_i32 = arith.constant 1 : i32
    %0 = arith.muli %arg0, %c1_i32 : i32
    %1 = arith.addi %0, %arg1 : i32
    %c0_i32 = arith.constant 0 : i32
    %c0_i32_0 = arith.constant 0 : i32
    return %1, %c0_i32 : i32, i32
  }
  func.func @transform_2(%arg0: i32, %arg1: i32) -> (i32, i32) {
    %c1_i32 = arith.constant 1 : i32
    %0 = arith.muli %arg0, %c1_i32 : i32
    %1 = arith.addi %0, %arg1 : i32
    %c0_i32 = arith.constant 0 : i32
    %c0_i32_0 = arith.constant 0 : i32
    return %1, %c0_i32 : i32, i32
  }
  func.func @transform_3(%arg0: i32, %arg1: i32) -> (i32, i32) {
    %c1_i32 = arith.constant 1 : i32
    %0 = arith.muli %arg0, %c1_i32 : i32
    %1 = arith.addi %0, %arg1 : i32
    %c0_i32 = arith.constant 0 : i32
    %c0_i32_0 = arith.constant 0 : i32
    return %1, %c0_i32 : i32, i32
  }
  func.func @transform_4(%arg0: i32, %arg1: i32) -> (i32, i32) {
    %c1_i32 = arith.constant 1 : i32
    %0 = arith.muli %arg0, %c1_i32 : i32
    %1 = arith.addi %0, %arg1 : i32
    %c0_i32 = arith.constant 0 : i32
    %c0_i32_0 = arith.constant 0 : i32
    return %1, %c0_i32 : i32, i32
  }
  func.func @transform_5(%arg0: i32, %arg1: i32) -> (i32, i32) {
    %c1_i32 = arith.constant 1 : i32
    %0 = arith.muli %arg0, %c1_i32 : i32
    %1 = arith.addi %0, %arg1 : i32
    %c0_i32 = arith.constant 0 : i32
    %c0_i32_0 = arith.constant 0 : i32
    return %1, %c0_i32 : i32, i32
  }
  func.func @transform_6(%arg0: i32, %arg1: i32) -> (i32, i32) {
    %c1_i32 = arith.constant 1 : i32
    %0 = arith.muli %arg0, %c1_i32 : i32
    %1 = arith.addi %0, %arg1 : i32
    %c0_i32 = arith.constant 0 : i32
    %c0_i32_0 = arith.constant 0 : i32
    return %1, %c0_i32 : i32, i32
  }
  func.func @transform_7(%arg0: i32, %arg1: i32) -> (i32, i32) {
    %c0_i32 = arith.constant 0 : i32
    %c0_i32_0 = arith.constant 0 : i32
    return %arg0, %c0_i32 : i32, i32
  }
}

</mosaic_0001>

<bundles_post_ra>
// kernel: tpu_custom_call.1
= control target key start
LH: loop header
LB: loop body
LE: loop exit
PB: predicated region body
PF: predicated region fallthrough
CT: control target
= control target key end

     0   :  { %12 = vsyncpa [#allocation4], 0  ;;  %s1043_s0 = inlined_call_operand.hbm [shape: f32[8,128], index: 0, kind: input, shape index: {}]   ;;  %s1044_s1 = inlined_call_operand.hbm [shape: f32[8,128], index: 1, kind: input, shape index: {}]   ;;  %s1045_s2 = inlined_call_operand.hbm [shape: f32[8,128], index: 2, kind: input, shape index: {}]   ;;  %s1046_s3 = inlined_call_operand.hbm [shape: f32[8,128], index: 3, kind: input, shape index: {}]   ;;  %s1047_s4 = inlined_call_operand.hbm [shape: f32[8,128], index: 4, kind: input, shape index: {}]   ;;  %s1048_s5 = inlined_call_operand.vmem [shape: f32[8,128], index: 5, kind: input, shape index: {}]   ;;  %s1049_s6 = inlined_call_operand.hbm [shape: f32[8,128], index: 6, kind: input, shape index: {}]   ;;  %s1050_s7 = inlined_call_operand.hbm [shape: f32[8,128], index: 7, kind: output, shape index: {}]  }
   0x1   :  { %13 = vsyncpa [#allocation7], 0 }
   0x2   :  { %14 = vsyncpa [#allocation10], 0 }
   0x3   :  { %15 = vsyncpa [#allocation13], 0 }
   0x4   :  { %16 = vsyncpa [#allocation5], 0  ;;  %s701_s24 = smov [#allocation6]   ;;  %s702_s26 = smov [#allocation9]  }
   0x5   :  { %s39_s25 = sshll.u32 %s701_s24, 4  ;;  %s65_s27 = sshll.u32 %s702_s26, 4  ;;  %s40_s25 = int_to_ptr.vmem [resolvable:$true] %s39_s25  ;;  %s66_s27 = int_to_ptr.vmem [resolvable:$true] %s65_s27 }
   0x6   :  { %s559_s28 = scalar_lea.vmem %s40_s25, 128  ;;  %p564_p1 = scmp.lt.s32.totalorder %s40_s25, %s40_s25 }
   0x7   :  { %p560_p0 = scmp.ne.s32.totalorder %s40_s25, %s559_s28  ;;  %p565_p2 = scmp.lt.s32.totalorder %s559_s28, %s559_s28 }
   0x9   :  { %p566_p3 = por %p565_p2, %p564_p1 }
   0xb   :  { %p567_p4 = pnand %p566_p3, %p560_p0 }
   0xd   :  { %570 = shalt.err (!%p567_p4)
}
   0xe   :  { %42 = dma.hbm_to_vmem [thread:$0]  %s1044_s1, 128, %s40_s25, [#allocation7]  }
   0xf   :  { %s579_s8 = scalar_lea.vmem %s66_s27, 128  ;;  %p584_p6 = scmp.lt.s32.totalorder %s66_s27, %s66_s27 }
  0x10   :  { %p580_p5 = scmp.ne.s32.totalorder %s66_s27, %s579_s8  ;;  %p585_p7 = scmp.lt.s32.totalorder %s579_s8, %s579_s8 }
  0x12   :  { %p586_p8 = por %p585_p7, %p584_p6 }
  0x14   :  { %p587_p9 = pnand %p586_p8, %p580_p5 }
  0x16   :  { %590 = shalt.err (!%p587_p9)
}
  0x17   :  { %68 = dma.hbm_to_vmem [thread:$0]  %s1046_s3, 128, %s66_s27, [#allocation10]  }
  0x18   :  { %s703_s11 = smov [#allocation3]   ;;  %s704_s13 = smov [#allocation8]  }
  0x19   :  { %s26_s12 = sshll.u32 %s703_s11, 4  ;;  %s52_s14 = sshll.u32 %s704_s13, 4  ;;  %s27_s12 = int_to_ptr.vmem [resolvable:$true] %s26_s12  ;;  %s53_s14 = int_to_ptr.vmem [resolvable:$true] %s52_s14 }
  0x1a   :  { %s599_s15 = scalar_lea.vmem %s27_s12, 128  ;;  %p604_p11 = scmp.lt.s32.totalorder %s27_s12, %s27_s12 }
  0x1b   :  { %p600_p10 = scmp.ne.s32.totalorder %s27_s12, %s599_s15  ;;  %p605_p12 = scmp.lt.s32.totalorder %s599_s15, %s599_s15 }
  0x1d   :  { %p606_p13 = por %p605_p12, %p604_p11 }
  0x1f   :  { %p607_p0 = pnand %p606_p13, %p600_p10 }
  0x21   :  { %610 = shalt.err (!%p607_p0)
}
  0x22   :  { %29 = dma.hbm_to_vmem [thread:$0]  %s1043_s0, 128, %s27_s12, [#allocation4]  }
  0x23   :  { %s619_s17 = scalar_lea.vmem %s53_s14, 128  ;;  %p624_p2 = scmp.lt.s32.totalorder %s53_s14, %s53_s14 }
  0x24   :  { %p620_p1 = scmp.ne.s32.totalorder %s53_s14, %s619_s17  ;;  %p625_p3 = scmp.lt.s32.totalorder %s619_s17, %s619_s17 }
  0x26   :  { %p626_p4 = por %p625_p3, %p624_p2 }
  0x28   :  { %p627_p5 = pnand %p626_p4, %p620_p1 }
  0x2a   :  { %630 = shalt.err (!%p627_p5)
}
  0x2b   :  { %55 = dma.hbm_to_vmem [thread:$0]  %s1045_s2, 128, %s53_s14, [#allocation7]  }
  0x2c   :  { %s705_s19 = smov [#allocation11]   ;;  %s706_s21 = smov [#allocation12]  }
  0x2d   :  { %s78_s20 = sshll.u32 %s705_s19, 4  ;;  %s99_s22 = sshll.u32 %s706_s21, 4  ;;  %s79_s20 = int_to_ptr.vmem [resolvable:$true] %s78_s20  ;;  %s100_s22 = int_to_ptr.vmem [resolvable:$true] %s99_s22 }
  0x2e   :  { %s639_s23 = scalar_lea.vmem %s79_s20, 128  ;;  %p644_p7 = scmp.lt.s32.totalorder %s79_s20, %s79_s20 }
  0x2f   :  { %p640_p6 = scmp.ne.s32.totalorder %s79_s20, %s639_s23  ;;  %p645_p8 = scmp.lt.s32.totalorder %s639_s23, %s639_s23 }
  0x31   :  { %p646_p9 = por %p645_p8, %p644_p7 }
  0x33   :  { %p647_p10 = pnand %p646_p9, %p640_p6 }
  0x35   :  { %650 = shalt.err (!%p647_p10)
}
  0x36   :  { %81 = dma.hbm_to_vmem [thread:$0]  %s1047_s4, 128, %s79_s20, [#allocation10]  }
  0x37   :  { %s659_s25 = scalar_lea.vmem %s100_s22, 128  ;;  %p664_p12 = scmp.lt.s32.totalorder %s100_s22, %s100_s22 }
  0x38   :  { %p660_p11 = scmp.ne.s32.totalorder %s100_s22, %s659_s25  ;;  %p665_p13 = scmp.lt.s32.totalorder %s659_s25, %s659_s25 }
  0x3a   :  { %p666_p0 = por %p665_p13, %p664_p12 }
  0x3c   :  { %p667_p1 = pnand %p666_p0, %p660_p11 }
  0x3e   :  { %670 = shalt.err (!%p667_p1)
}
  0x3f   :  { %102 = dma.hbm_to_vmem [thread:$0]  %s1049_s6, 128, %s100_s22, [#allocation13]  }
  0x40   :  { %691 = dma.done.wait [#allocation4], 128  }
  0x41   :  { %692 = vsyncadd [#allocation4], 4294967168 }
  0x42   :  { %693 = dma.done.wait [#allocation7], 256  }
  0x43   :  { %694 = vsyncadd [#allocation7], 4294967040 }
  0x44   :  { %695 = dma.done.wait [#allocation10], 256  }
  0x45   :  { %696 = vsyncadd [#allocation10], 4294967040 }
  0x46   :  { %697 = dma.done.wait [#allocation13], 128  }
  0x47   :  { %698 = vsyncadd [#allocation13], 4294967168  ;;  %v144_v0 = vld [vmem:[#allocation6] sm:$0xff]  ;;  %v766_v1 = vld [vmem:[#allocation8] sm:$0xff] }
  0x48   :  { %v146_v2 = vmin.f32 %v144_v0, 1000000.0  ;;  %v195_v3 = vadd.f32 1.0, %v766_v1  ;;  %v292_v16 = vld [vmem:[#allocation11] sm:$0xff]  ;;  %v809_v34 = vld [vmem:[#allocation12] sm:$0xff]  ;;  %v289_v46 = vld [vmem:[#allocation9] sm:$0xff] }
  0x49   :  { %v787_v19 = vmin.f32 %v292_v16, 1000000.0  ;;  %v143_v24 = vld [vmem:[#allocation3] sm:$0xff]  ;;  %v829_v42 = vadd.f32 1.0, %v809_v34 }
  0x4a   :  { %v147_v4 = vadd.f32 1e-10, %v146_v2  ;;  %v770_v5 = vadd.f32 %v146_v2, %v766_v1  ;;  %v198_v6 = vadd.f32 1.0, %v195_v3  ;;  %vm196_vm0 = vcmp.lt.f32.partialorder %v195_v3, 5.0 }
  0x4b   :  { %v791_v22 = vadd.f32 1e-10, %v787_v19  ;;  %v154_v26 = vadd.f32 1e-10, %v143_v24  ;;  %v150_v30 = vadd.f32 %v146_v2, %v143_v24  ;;  %v197_v36 = vsel %vm196_vm0, %v195_v3, 1.0 }
  0x4c   :  { %v159_v7 = vadd.f32 1.0, %v147_v4  ;;  %vm157_vm1 = vcmp.lt.f32.partialorder %v147_v4, 5.0  ;;  %v773_v8 = vadd.f32 1e-10, %v770_v5  ;;  %v199_v9 = vsel %vm196_vm0, %v198_v6, %v195_v3 }
  0x4d   :  { %v203_v11 = vadd.f32 1.0, %v199_v9  ;;  %vm200_vm2 = vcmp.lt.f32.partialorder %v199_v9, 5.0  ;;  %vm304_vm8 = vcmp.lt.f32.partialorder %v791_v22, 5.0  ;;  %v306_v28 = vadd.f32 1.0, %v791_v22 }
  0x4e   :  { %v160_v10 = vsel %vm157_vm1, %v159_v7, %v147_v4  ;;  %v238_v12 = vadd.f32 1.0, %v773_v8  ;;  %vm236_vm3 = vcmp.lt.f32.partialorder %v773_v8, 5.0  ;;  %501 = vlog2.f32 %v154_v26 }
  0x4f   :  { %v164_v13 = vadd.f32 1.0, %v160_v10  ;;  %vm161_vm4 = vcmp.lt.f32.partialorder %v160_v10, 5.0  ;;  %v204_v14 = vsel %vm200_vm2, %v203_v11, %v199_v9  ;;  %v807_v32 = vsel %vm304_vm8, %v306_v28, %v791_v22 }
  0x50   :  { %v783_v15 = vsel %vm236_vm3, %v238_v12, %v773_v8  ;;  %v208_v18 = vadd.f32 1.0, %v204_v14  ;;  %vm205_vm6 = vcmp.lt.f32.partialorder %v204_v14, 5.0  ;;  %vm308_vm11 = vcmp.lt.f32.partialorder %v807_v32, 5.0 }
  0x51   :  { %v165_v17 = vsel %vm161_vm4, %v164_v13, %v160_v10  ;;  %vm240_vm5 = vcmp.lt.f32.partialorder %v783_v15, 5.0  ;;  %v243_v21 = vadd.f32 1.0, %v783_v15  ;;  %v311_v35 = vadd.f32 1.0, %v807_v32 }
  0x52   :  { %v169_v20 = vadd.f32 1.0, %v165_v17  ;;  %vm166_vm7 = vcmp.lt.f32.partialorder %v165_v17, 5.0  ;;  %v209_v25 = vsel %vm205_vm6, %v208_v18, %v204_v14  ;;  %v201_v37 = vsel %vm200_vm2, %v199_v9, 1.0 }
  0x53   :  { %v796_v23 = vsel %vm240_vm5, %v243_v21, %v783_v15  ;;  %v213_v31 = vadd.f32 1.0, %v209_v25  ;;  %vm210_vm10 = vcmp.lt.f32.partialorder %v209_v25, 5.0  ;;  %v823_v39 = vsel %vm308_vm11, %v311_v35, %v807_v32 }
  0x54   :  { %v170_v27 = vsel %vm166_vm7, %v169_v20, %v165_v17  ;;  %v248_v29 = vadd.f32 1.0, %v796_v23  ;;  %vm245_vm9 = vcmp.lt.f32.partialorder %v796_v23, 5.0  ;;  %vm313_vm13 = vcmp.lt.f32.partialorder %v823_v39, 5.0 }
  0x55   :  { %v174_v33 = vadd.f32 1.0, %v170_v27  ;;  %vm171_vm12 = vcmp.lt.f32.partialorder %v170_v27, 5.0  ;;  %v214_v40 = vsel %vm210_vm10, %v213_v31, %v209_v25  ;;  %v316_v41 = vadd.f32 1.0, %v823_v39 }
  0x56   :  { %v818_v38 = vsel %vm245_vm9, %v248_v29, %v796_v23  ;;  %503 = vlog2.f32 %v147_v4  ;;  %v151_v43 = vadd.f32 1e-10, %v150_v30  ;;  %v158_v44 = vsel %vm157_vm1, %v147_v4, 1.0 }
  0x57   :  { %v175_v45 = vsel %vm171_vm12, %v174_v33, %v170_v27  ;;  %v162_v47 = vsel %vm161_vm4, %v160_v10, 1.0  ;;  %v202_v48 = vmul.f32 %v201_v37, %v197_v36  ;;  %v206_v49 = vsel %vm205_vm6, %v204_v14, 1.0 }
  0x58   :  { %v253_v50 = vadd.f32 1.0, %v818_v38  ;;  %vm215_vm14 = vcmp.lt.f32.partialorder %v214_v40, 5.0  ;;  %v218_v51 = vadd.f32 1.0, %v214_v40  ;;  %vm250_vm15 = vcmp.lt.f32.partialorder %v818_v38, 5.0 }
  0x59   :  { %v840_v52 = vsel %vm313_vm13, %v316_v41, %v823_v39  ;;  %v179_v53 = vadd.f32 1.0, %v175_v45  ;;  %v297_v54 = vadd.f32 %v787_v19, %v289_v46  ;;  %v345_v55 = vadd.f32 1.0, %v829_v42 }
  0x5a   :  { %vm318_vm0 = vcmp.lt.f32.partialorder %v840_v52, 5.0  ;;  %v163_v56 = vmul.f32 %v162_v47, %v158_v44  ;;  %vm176_vm1 = vcmp.lt.f32.partialorder %v175_v45, 5.0  ;;  %v321_v57 = vadd.f32 1.0, %v840_v52 }
  0x5b   :  { %vm343_vm2 = vcmp.lt.f32.partialorder %v829_v42, 5.0  ;;  %505 = vlog2.f32 %v151_v43  ;;  %v167_v58 = vsel %vm166_vm7, %v165_v17, 1.0  ;;  %v851_v59 = vsel %vm250_vm15, %v253_v50, %v818_v38  ;;  %v879_v11 = vpop.eup %501 }
  0x5c   :  { %v207_v60 = vmul.f32 %v206_v49, %v202_v48  ;;  %v854_v61 = vsel %vm215_vm14, %v218_v51, %v214_v40  ;;  %507 = vlog2.f32 %v791_v22  ;;  %v860_v62 = vsel %vm318_vm0, %v321_v57, %v840_v52 }
  0x5d   :  { %v863_v63 = vsel %vm176_vm1, %v179_v53, %v175_v45  ;;  %v298_v0 = vadd.f32 1e-10, %v297_v54  ;;  %v346_v2 = vsel %vm343_vm2, %v345_v55, %v829_v42  ;;  %v870_v3 = vadd.f32 %v787_v19, %v809_v34 }
  0x5e   :  { %v168_v4 = vmul.f32 %v167_v58, %v163_v56  ;;  %v211_v6 = vsel %vm210_vm10, %v209_v25, 1.0  ;;  %v258_v7 = vadd.f32 1.0, %v851_v59  ;;  %vm323_vm4 = vcmp.lt.f32.partialorder %v860_v62, 5.0 }
  0x5f   :  { %v172_v9 = vsel %vm171_vm12, %v170_v27, 1.0  ;;  %509 = vrcp.f32 %v854_v61  ;;  %vm255_vm6 = vcmp.lt.f32.partialorder %v851_v59, 5.0  ;;  %v326_v10 = vadd.f32 1.0, %v860_v62 }
  0x60   :  { %511 = vrcp.f32 %v863_v63  ;;  %vm347_vm7 = vcmp.lt.f32.partialorder %v346_v2, 5.0  ;;  %v350_v12 = vadd.f32 1.0, %v346_v2  ;;  %v888_v14 = vadd.f32 1e-10, %v870_v3 }
  0x61   :  { %513 = vlog2.f32 %v298_v0  ;;  %v885_v13 = vsel %vm323_vm4, %v326_v10, %v860_v62  ;;  %v173_v16 = vmul.f32 %v172_v9, %v168_v4  ;;  %v212_v17 = vmul.f32 %v211_v6, %v207_v60 }
  0x62   :  { %515 = vlog2.f32 %v863_v63  ;;  %v894_v18 = vsel %vm255_vm6, %v258_v7, %v851_v59  ;;  %v177_v21 = vsel %vm176_vm1, %v175_v45, 1.0  ;;  %v216_v24 = vsel %vm215_vm14, %v214_v40, 1.0 }
  0x63   :  { %v896_v20 = vpop.eup %503  ;;  %517 = vrcp.f32 %v885_v13  ;;  %v351_v25 = vsel %vm347_vm7, %v350_v12, %v346_v2  ;;  %v237_v26 = vsel %vm236_vm3, %v773_v8, 1.0  ;;  %v241_v27 = vsel %vm240_vm5, %v783_v15, 1.0 }
  0x64   :  { %vm352_vm10 = vcmp.lt.f32.partialorder %v351_v25, 5.0  ;;  %v355_v28 = vadd.f32 1.0, %v351_v25  ;;  %519 = vrcp.f32 %v894_v18  ;;  %v301_v29 = vadd.f32 1e-10, %v289_v46 }
  0x65   :  { %vm383_vm12 = vcmp.lt.f32.partialorder %v888_v14, 5.0  ;;  %v385_v30 = vadd.f32 1.0, %v888_v14  ;;  %v178_v31 = vmul.f32 %v177_v21, %v173_v16  ;;  %v217_v33 = vmul.f32 %v216_v24, %v212_v17 }
  0x66   :  { %521 = vlog2.f32 %v854_v61  ;;  %v356_v35 = vsel %vm352_vm10, %v355_v28, %v351_v25  ;;  %v914_v8 = vadd.f32 -0.5, %v863_v63  ;;  %v242_v36 = vmul.f32 %v241_v27, %v237_v26 }
  0x67   :  { %vm357_vm3 = vcmp.lt.f32.partialorder %v356_v35, 5.0  ;;  %v360_v15 = vadd.f32 1.0, %v356_v35  ;;  %v246_v40 = vsel %vm245_vm9, %v796_v23, 1.0  ;;  %v305_v41 = vsel %vm304_vm8, %v791_v22, 1.0 }
  0x68   :  { %v916_v37 = vpop.eup %505  ;;  %v309_v43 = vsel %vm308_vm11, %v807_v32, 1.0  ;;  %v386_v44 = vsel %vm383_vm12, %v385_v30, %v888_v14  ;;  %v931_v46 = vadd.f32 -0.5, %v854_v61  ;;  %v344_v23 = vsel %vm343_vm2, %v829_v42, 1.0 }
  0x69   :  { %v508_v45 = vpop.eup %507  ;;  %v348_v47 = vsel %vm347_vm7, %v346_v2, 1.0  ;;  %v361_v22 = vsel %vm357_vm3, %v360_v15, %v356_v35  ;;  %523 = vlog2.f32 %v885_v13  ;;  %vm387_vm8 = vcmp.lt.f32.partialorder %v386_v44, 5.0 }
  0x6a   :  { %vm362_vm5 = vcmp.lt.f32.partialorder %v361_v22, 5.0  ;;  %v365_v32 = vadd.f32 1.0, %v361_v22  ;;  %v247_v48 = vmul.f32 %v246_v40, %v242_v36  ;;  %525 = vlog2.f32 %v301_v29 }
  0x6b   :  { %v310_v49 = vmul.f32 %v309_v43, %v305_v41  ;;  %v390_v50 = vadd.f32 1.0, %v386_v44  ;;  %v251_v53 = vsel %vm250_vm15, %v818_v38, 1.0  ;;  %527 = vlog2.f32 %v894_v18 }
  0x6c   :  { %v939_v51 = vpop.eup %509  ;;  %v314_v42 = vsel %vm313_vm13, %v823_v39, 1.0  ;;  %v949_v54 = vsel %vm362_vm5, %v365_v32, %v361_v22  ;;  %v953_v56 = vmul.f32 %v217_v33, %v178_v31  ;;  %v349_v57 = vmul.f32 %v348_v47, %v344_v23 }
  0x6d   :  { %v951_v55 = vpop.eup %511  ;;  %529 = vrcp.f32 %v949_v54  ;;  %v391_v58 = vsel %vm387_vm8, %v390_v50, %v386_v44  ;;  %v353_v38 = vsel %vm352_vm10, %v351_v25, 1.0  ;;  %v221_v2 = vmul.f32 %v939_v51, %v939_v51 }
  0x6e   :  { %v514_v60 = vpop.eup %513  ;;  %531 = vlog2.f32 %v949_v54  ;;  %vm392_vm9 = vcmp.lt.f32.partialorder %v391_v58, 5.0  ;;  %v395_v0 = vadd.f32 1.0, %v391_v58  ;;  %v961_v4 = vmul.f32 %v251_v53, %v247_v48 }
  0x6f   :  { %v516_v39 = vpop.eup %515  ;;  %v963_v6 = vmul.f32 0.6931472, %v508_v45  ;;  %v315_v7 = vmul.f32 %v314_v42, %v310_v49  ;;  %v182_v10 = vmul.f32 %v951_v55, %v951_v55  ;;  %v384_v12 = vsel %vm383_vm12, %v888_v14, 1.0 }
  0x70   :  { %v965_v9 = vpop.eup %517  ;;  %v388_v16 = vsel %vm387_vm8, %v386_v44, 1.0  ;;  %v396_v17 = vsel %vm392_vm9, %v395_v0, %v391_v58  ;;  %v974_v21 = vmul.f32 0.6931472, %v514_v60  ;;  %v354_v24 = vmul.f32 %v353_v38, %v349_v57 }
  0x71   :  { %vm397_vm11 = vcmp.lt.f32.partialorder %v396_v17, 5.0  ;;  %v400_v25 = vadd.f32 1.0, %v396_v17  ;;  %v976_v26 = vpop.eup %519  ;;  %v190_v27 = vmul.f32 0.6931472, %v516_v39  ;;  %v256_v28 = vsel %vm255_vm6, %v851_v59, 1.0 }
  0x72   :  { %v319_v14 = vsel %vm318_vm0, %v840_v52, 1.0  ;;  %v358_v29 = vsel %vm357_vm3, %v356_v35, 1.0  ;;  %v222_v31 = vmul.f32 0.0007936508, %v221_v2  ;;  %v329_v33 = vmul.f32 %v965_v9, %v965_v9 }
  0x73   :  { %v522_v30 = vpop.eup %521  ;;  %v389_v36 = vmul.f32 %v388_v16, %v384_v12  ;;  %v401_v15 = vsel %vm397_vm11, %v400_v25, %v396_v17  ;;  %v183_v40 = vmul.f32 0.0007936508, %v182_v10  ;;  %v393_v41 = vsel %vm392_vm9, %v391_v58, 1.0 }
  0x74   :  { %vm402_vm13 = vcmp.lt.f32.partialorder %v401_v15, 5.0  ;;  %v405_v43 = vadd.f32 1.0, %v401_v15  ;;  %v261_v59 = vmul.f32 %v976_v26, %v976_v26  ;;  %v320_v44 = vmul.f32 %v319_v14, %v315_v7 }
  0x75   :  { %v359_v52 = vmul.f32 %v358_v29, %v354_v24  ;;  %v441_v35 = vsub.f32 %v963_v6, %v974_v21  ;;  %v229_v45 = vmul.f32 0.6931472, %v522_v30  ;;  %v324_v23 = vsel %vm323_vm4, %v860_v62, 1.0 }
  0x76   :  { %v363_v47 = vsel %vm362_vm5, %v361_v22, 1.0  ;;  %v998_v32 = vsel %vm402_vm13, %v405_v43, %v401_v15  ;;  %v524_v48 = vpop.eup %523  ;;  %v191_v49 = vmul.f32 %v914_v8, %v190_v27  ;;  %v330_v50 = vmul.f32 0.0007936508, %v329_v33 }
  0x77   :  { %v394_v53 = vmul.f32 %v393_v41, %v389_v36  ;;  %533 = vrcp.f32 %v998_v32  ;;  %v1002_v42 = vpop.eup %525  ;;  %v223_v57 = vadd.f32 -0.0027777778, %v222_v31  ;;  %v398_v58 = vsel %vm397_vm11, %v396_v17, 1.0 }
  0x78   :  { %535 = vlog2.f32 %v998_v32  ;;  %v442_v62 = vmul.f32 %v441_v35, %v787_v19  ;;  %v528_v22 = vpop.eup %527  ;;  %v184_v60 = vadd.f32 -0.0027777778, %v183_v40  ;;  %v262_v38 = vmul.f32 0.0007936508, %v261_v59 }
  0x79   :  { %v325_v0 = vmul.f32 %v324_v23, %v320_v44  ;;  %v364_v39 = vmul.f32 %v363_v47, %v359_v52  ;;  %v230_v8 = vmul.f32 %v931_v46, %v229_v45  ;;  %v491_v12 = vadd.f32 -0.5, %v885_v13 }
  0x7a   :  { %v530_v7 = vpop.eup %529  ;;  %v337_v16 = vmul.f32 0.6931472, %v524_v48  ;;  %v443_v24 = vmul.f32 1.442695, %v442_v62  ;;  %v331_v27 = vadd.f32 -0.0027777778, %v330_v50  ;;  %v399_v29 = vmul.f32 %v398_v58, %v394_v53 }
  0x7b   :  { %v532_v25 = vpop.eup %531  ;;  %v368_v14 = vmul.f32 %v530_v7, %v530_v7  ;;  %v492_v17 = vadd.f32 -0.5, %v949_v54  ;;  %v224_v30 = vmul.f32 %v223_v57, %v221_v2  ;;  %v403_v31 = vsel %vm402_vm13, %v401_v15, 1.0 }
  0x7c   :  { %v376_v19 = vmul.f32 0.6931472, %v532_v25  ;;  %537 = vpow2.f32 %v443_v24  ;;  %v185_v36 = vmul.f32 %v184_v60, %v182_v10  ;;  %v263_v40 = vadd.f32 -0.0027777778, %v262_v38 }
  0x7d   :  { %v369_v41 = vmul.f32 0.0007936508, %v368_v14  ;;  %v423_v43 = vmul.f32 %v364_v39, %v325_v0  ;;  %v257_v46 = vmul.f32 %v256_v28, %v961_v4  ;;  %v490_v44 = vadd.f32 -0.5, %v894_v18  ;;  %v291_v4 = vld [vmem:[%s1048_s5] sm:$0xff]  ;;  %s707_s5 = smov [#allocation14]  }
  0x7e   :  { %v269_v52 = vmul.f32 0.6931472, %v528_v22  ;;  %v338_v35 = vmul.f32 %v491_v12, %v337_v16  ;;  %v332_v45 = vmul.f32 %v331_v27, %v329_v33  ;;  %v377_v47 = vmul.f32 %v492_v17, %v376_v19  ;;  %s470_s27 = sshll.u32 %s707_s5, 4  ;;  %s471_s27 = int_to_ptr.vmem [resolvable:$true] %s470_s27 }
  0x7f   :  { %v370_v23 = vadd.f32 -0.0027777778, %v369_v41  ;;  %v404_v48 = vmul.f32 %v403_v31, %v399_v29  ;;  %v192_v2 = vsub.f32 %v191_v49, %v863_v63  ;;  %v225_v50 = vadd.f32 0.083333336, %v224_v30  ;;  %s671_s28 = scalar_lea.vmem %s471_s27, 128  ;;  %p676_p3 = scmp.lt.s32.totalorder %s471_s27, %s471_s27 }
  0x80   :  { %v231_v15 = vsub.f32 %v230_v8, %v854_v61  ;;  %539 = vlog2.f32 %v953_v56  ;;  %v186_v10 = vadd.f32 0.083333336, %v185_v36  ;;  %v264_v53 = vmul.f32 %v263_v40, %v261_v59  ;;  %p672_p2 = scmp.ne.s32.totalorder %s471_s27, %s671_s28  ;;  %p677_p4 = scmp.lt.s32.totalorder %s671_s28, %s671_s28 }
  0x81   :  { %v371_v28 = vmul.f32 %v370_v23, %v368_v14  ;;  %541 = vlog2.f32 %v423_v43  ;;  %v270_v57 = vmul.f32 %v490_v44, %v269_v52  ;;  %v339_v33 = vsub.f32 %v338_v35, %v885_v13 }
  0x82   :  { %543 = vlog2.f32 %v257_v46  ;;  %v333_v58 = vadd.f32 0.083333336, %v332_v45  ;;  %v378_v63 = vsub.f32 %v377_v47, %v949_v54  ;;  %v193_v49 = vadd.f32 0.9189385, %v192_v2  ;;  %p678_p5 = por %p677_p4, %p676_p3 }
  0x83   :  { %v372_v62 = vadd.f32 0.083333336, %v371_v28  ;;  %545 = vlog2.f32 %v404_v48  ;;  %v232_v56 = vadd.f32 0.9189385, %v231_v15  ;;  %v493_v59 = vadd.f32 -0.5, %v998_v32 }
  0x84   :  { %v534_v61 = vpop.eup %533  ;;  %v436_v22 = vsub.f32 1.0, %v291_v4  ;;  %v187_v38 = vmul.f32 %v951_v55, %v186_v10  ;;  %v226_v0 = vmul.f32 %v939_v51, %v225_v50  ;;  %v265_v39 = vadd.f32 0.083333336, %v264_v53  ;;  %p679_p6 = pnand %p678_p5, %p672_p2 }
  0x85   :  { %v536_v60 = vpop.eup %535  ;;  %v408_v8 = vmul.f32 %v534_v61, %v534_v61  ;;  %v271_v13 = vsub.f32 %v270_v57, %v894_v18  ;;  %v340_v12 = vadd.f32 0.9189385, %v339_v33  ;;  %v334_v54 = vmul.f32 %v965_v9, %v333_v58 }
  0x86   :  { %v416_v16 = vmul.f32 0.6931472, %v536_v60  ;;  %v437_v24 = vadd.f32 1e-10, %v436_v22  ;;  %v373_v25 = vmul.f32 %v530_v7, %v372_v62  ;;  %v379_v27 = vadd.f32 0.9189385, %v378_v63 }
  0x87   :  { %v409_v14 = vmul.f32 0.0007936508, %v408_v8  ;;  %v194_v30 = vadd.f32 %v193_v49, %v187_v38  ;;  %v233_v19 = vadd.f32 %v232_v56, %v226_v0  ;;  %v303_v55 = vmul.f32 0.6931472, %v1002_v42 }
  0x88   :  { %v417_v17 = vmul.f32 %v493_v59, %v416_v16  ;;  %v272_v51 = vadd.f32 0.9189385, %v271_v13  ;;  %547 = vlog2.f32 %v437_v24  ;;  %v266_v40 = vmul.f32 %v976_v26, %v265_v39 }
  0x89   :  { %v538_v29 = vpop.eup %537  ;;  %v410_v31 = vadd.f32 -0.0027777778, %v409_v14  ;;  %v341_v41 = vadd.f32 %v340_v12, %v334_v54  ;;  %v380_v43 = vadd.f32 %v379_v27, %v373_v25  ;;  %v156_v7 = vmul.f32 0.6931472, %v879_v11 }
  0x8a   :  { %v418_v36 = vsub.f32 %v417_v17, %v998_v32  ;;  %v445_v18 = vmul.f32 %v538_v29, %v436_v22  ;;  %v149_v52 = vmul.f32 0.6931472, %v896_v20  ;;  %v153_v23 = vmul.f32 0.6931472, %v916_v37 }
  0x8b   :  { %v411_v9 = vmul.f32 %v410_v31, %v408_v8  ;;  %v430_v32 = vsub.f32 %v974_v21, %v963_v6  ;;  %v432_v47 = vsub.f32 %v963_v6, %v303_v55  ;;  %v273_v2 = vadd.f32 %v272_v51, %v266_v40 }
  0x8c   :  { %v446_v46 = vadd.f32 %v445_v18, %v291_v4  ;;  %v419_v45 = vadd.f32 0.9189385, %v418_v36  ;;  %v274_v50 = vadd.f32 %v233_v19, %v194_v30  ;;  %v421_v11 = vadd.f32 %v380_v43, %v341_v41 }
  0x8d   :  { %v540_v44 = vpop.eup %539  ;;  %v412_v35 = vadd.f32 0.083333336, %v411_v9  ;;  %v283_v4 = vsub.f32 %v153_v23, %v149_v52  ;;  %v285_v28 = vsub.f32 %v149_v52, %v156_v7  ;;  %v431_v57 = vmul.f32 %v430_v32, %v870_v3 }
  0x8e   :  { %v542_v42 = vpop.eup %541  ;;  %v447_v26 = vadd.f32 1e-10, %v446_v46  ;;  %v433_v37 = vmul.f32 %v432_v47, %v809_v34  ;;  %v275_v33 = vsub.f32 %v274_v50, %v273_v2  ;;  %v278_v21 = vmul.f32 0.6931472, %v540_v44 }
  0x8f   :  { %v544_v48 = vpop.eup %543  ;;  %v413_v15 = vmul.f32 %v534_v61, %v412_v35  ;;  %v425_v20 = vmul.f32 0.6931472, %v542_v42  ;;  %v286_v63 = vmul.f32 %v285_v28, %v766_v1  ;;  %v284_v22 = vmul.f32 %v283_v4, %v770_v5 }
  0x90   :  { %v546_v10 = vpop.eup %545  ;;  %549 = vlog2.f32 %v447_v26  ;;  %v434_v49 = vadd.f32 %v433_v37, %v431_v57  ;;  %v279_v56 = vsub.f32 %v275_v33, %v278_v21  ;;  %v281_v59 = vmul.f32 0.6931472, %v544_v48 }
  0x91   :  { %v420_v53 = vadd.f32 %v419_v45, %v413_v15  ;;  %v428_v6 = vmul.f32 0.6931472, %v546_v10  ;;  %v287_v3 = vadd.f32 %v286_v63, %v284_v22  ;;  %vm451_vm14 = vcmp.lt.f32.partialorder %v809_v34, 1e-08 }
  0x92   :  { %v282_v39 = vadd.f32 %v281_v59, %v279_v56 }
  0x93   :  { %v422_v58 = vsub.f32 %v421_v11, %v420_v53 }
  0x94   :  { %v288_v16 = vadd.f32 %v287_v3, %v282_v39 }
  0x95   :  { %v426_v62 = vsub.f32 %v422_v58, %v425_v20  ;;  %v548_v61 = vpop.eup %547 }
  0x96   :  { %v439_v0 = vmul.f32 0.6931472, %v548_v61 }
  0x97   :  { %v429_v60 = vadd.f32 %v428_v6, %v426_v62 }
  0x99   :  { %v435_v38 = vadd.f32 %v434_v49, %v429_v60 }
  0x9b   :  { %v440_v13 = vsub.f32 %v435_v38, %v439_v0 }
  0x9d   :  { %v550_v8 = vpop.eup %549 }
  0x9e   :  { %v449_v12 = vmul.f32 0.6931472, %v550_v8 }
  0xa0   :  { %v450_v24 = vsub.f32 0.0, %v449_v12 }
  0xa2   :  { %v452_v54 = vsel %vm451_vm14, %v450_v24, %v440_v13 }
  0xa3   :  { %v453_v1 = vadd.f32 %v452_v54, %v288_v16 }
  0xa5   :  { %v462_v25 = vmul.f32 0.0009765625, %v453_v1 }
  0xa7   :  { %463 = vst [vmem:[#allocation14] sm:$0xff] %v462_v25 }
  0xa8   :  { %682 = shalt.err (!%p679_p6)
}
  0xa9   :  { %473 = dma.vmem_to_hbm [thread:$0]  %s471_s27, 128, %s1050_s7, [#allocation5]  }
  0xaa   :  { %699 = dma.done.wait [#allocation5], 128  }
  0xab   :  { %700 = vsyncadd [#allocation5], 4294967168 }
  0xac   :  { %477 = vsyncpa [#allocation4], 1 }
  0xad   :  { %478 = vsyncpa [#allocation7], 1 }
  0xae   :  { %479 = vsyncpa [#allocation10], 1 }
  0xaf   :  { %480 = vsyncpa [#allocation13], 1 }
  0xb0   :  { %481 = vsyncpa [#allocation5], 1 }

</bundles_post_ra>
